<compile_context>
chip_gen: v5e
topology: v5e:2x2
jax: 0.10.0
libtpu: 0.0.40
codegen_flags: <defaults>
</compile_context>

<pallas_src>
import jax
import jax.numpy as jnp
from jax.experimental import pallas as pl
from jax.experimental.pallas import tpu as pltpu


# ----------------------------- fused model kernel -----------------------------
def _make_fused_kernel(num_layers, T, Bblk, H):
    """Builds the fused (all layers + LayerNorm) kernel for static sizes.

    Gate order inside the kernel is (i, f, o, g): sigmoid gates are the first 3H
    contiguous columns, the tanh gate is the last H columns.
    """

    def kernel(*refs):
        # ---- parse refs: inputs..., output, scratch ----
        idx = 0
        xg0_ref = refs[idx]; idx += 1                                    # (T, Bblk, 4H) layer-0 gates (bias folded)
        wih_refs = refs[idx:idx + num_layers - 1]; idx += num_layers - 1  # (H, 4H) for layers >= 1
        whh_refs = refs[idx:idx + num_layers]; idx += num_layers          # (H, 4H) per layer
        b_refs = refs[idx:idx + num_layers - 1]; idx += num_layers - 1    # (1, 4H) for layers >= 1
        gamma_ref = refs[idx]; beta_ref = refs[idx + 1]; idx += 2         # (1, H) each
        out_ref = refs[idx]; idx += 1                                     # (Bblk, H)
        xg_scr = refs[idx] if num_layers > 1 else None                    # (T, Bblk, 4H) VMEM scratch

        def run_layer(read_xg, whh_ref, wih_next_ref, b_next_ref):
            # Hoist weight vreg loads (and the bias broadcast) out of the time loop.
            whh = whh_ref[...]                                            # (H, 4H)
            project_next = wih_next_ref is not None
            if project_next:
                wih_n = wih_next_ref[...]                                 # (H, 4H)
                b_n = jnp.broadcast_to(b_next_ref[...], (Bblk, 4 * H))    # hoisted broadcast
            h = jnp.zeros((Bblk, H), jnp.float32)
            c = jnp.zeros((Bblk, H), jnp.float32)
            # T is small & static -> fully unrolled straight-line recurrence.
            for t in range(T):
                gates = read_xg(t) + jnp.dot(
                    h, whh, preferred_element_type=jnp.float32)           # (Bblk, 4H) order i,f,o,g
                sig = jax.nn.sigmoid(gates[:, :3 * H])                    # one EUP launch for i,f,o
                i_g = sig[:, 0 * H:1 * H]
                f_g = sig[:, 1 * H:2 * H]
                o_g = sig[:, 2 * H:3 * H]
                g_g = jnp.tanh(gates[:, 3 * H:])                          # one EUP launch for g
                c = f_g * c + i_g * g_g
                h = o_g * jnp.tanh(c)
                if project_next:
                    # Next layer's input projection: off the h_{t+1} dependency
                    # chain, so the MXU does it in the recurrence's slack.
                    # Reading xg_scr[t] happened above (layers >= 1), so the
                    # in-place overwrite of the same rows is safe.
                    xg_scr[t] = jnp.dot(
                        h, wih_n, preferred_element_type=jnp.float32) + b_n
            return h

        # ---- layer 0: projected gates (incl. bias) precomputed outside kernel ----
        h_last = run_layer(
            lambda t: xg0_ref[t], whh_refs[0],
            wih_refs[0] if num_layers > 1 else None,
            b_refs[0] if num_layers > 1 else None)

        # ---- layers 1 .. L-1 (read gates from scratch, write next layer's in-place) ----
        for layer in range(1, num_layers):
            is_last = layer == num_layers - 1
            h_last = run_layer(
                lambda t: xg_scr[t], whh_refs[layer],
                None if is_last else wih_refs[layer],
                None if is_last else b_refs[layer])

        # ---- fused LayerNorm on the final hidden state of the last layer ----
        x = h_last                                                        # (Bblk, H)
        mean = jnp.mean(x, axis=-1, keepdims=True)
        var = jnp.mean((x - mean) ** 2, axis=-1, keepdims=True)
        inv = jax.lax.rsqrt(var + 1e-5)
        out_ref[...] = ((x - mean) * inv) * gamma_ref[...] + beta_ref[...]

    return kernel


# --------------------------------- wrapper ------------------------------------
def lstm_model_forward(x_btd, params, *, b_block=None):
    """x_btd: (B, T, input_size) batch_first, like the PyTorch module."""
    layers = params["layers"]
    num_layers = len(layers)
    B, T, _ = x_btd.shape
    H = layers[0][1].shape[1]                          # whh: (4H, H)
    x = x_btd.astype(jnp.float32)

    # Pad batch to the f32 sublane multiple of 8 (pad rows sliced off at the end).
    B_pad = ((B + 7) // 8) * 8
    if B_pad != B:
        x = jnp.pad(x, ((0, B_pad - B), (0, 0), (0, 0)))

    # One batch block by default; pass b_block (multiple of 8 dividing B_pad) to
    # shard independent batch slices across TensorCores on v7x.
    if b_block is None:
        b_block = B_pad
    assert B_pad % b_block == 0 and b_block % 8 == 0
    num_b_blocks = B_pad // b_block

    # Gate-column permutation (i, f, g, o) -> (i, f, o, g): sigmoid gates become
    # one contiguous 3H slab, tanh gate the last H columns.
    perm = jnp.concatenate([
        jnp.arange(0, H), jnp.arange(H, 2 * H),
        jnp.arange(3 * H, 4 * H), jnp.arange(2 * H, 3 * H)])

    # Hoisted layer-0 input projection as ONE big matmul, time-major output,
    # with both biases folded in.
    wih0, _, bih0, bhh0 = layers[0]
    wih0_p = wih0[perm]                                              # (4H, D)
    b0_p = (bih0 + bhh0)[perm]
    xg0 = jnp.einsum('btd,gd->tbg', x, wih0_p) + b0_p.reshape(1, 1, -1)  # (T, B_pad, 4H)

    wih_rest = [l[0][perm].T for l in layers[1:]]                    # (H, 4H) each
    whh_all = [l[1][perm].T for l in layers]                         # (H, 4H) each
    b_rest = [(l[2] + l[3])[perm].reshape(1, -1) for l in layers[1:]]  # (1, 4H) each

    gamma = params["ln_gamma"].reshape(1, H).astype(jnp.float32)
    beta = params["ln_beta"].reshape(1, H).astype(jnp.float32)

    kernel = _make_fused_kernel(num_layers, T, b_block, H)

    in_specs = [pl.BlockSpec((T, b_block, 4 * H), lambda b: (0, b, 0))]           # xg0
    in_specs += [pl.BlockSpec((H, 4 * H), lambda b: (0, 0))] * (num_layers - 1)   # wih (layers>=1)
    in_specs += [pl.BlockSpec((H, 4 * H), lambda b: (0, 0))] * num_layers         # whh
    in_specs += [pl.BlockSpec((1, 4 * H), lambda b: (0, 0))] * (num_layers - 1)   # bias (layers>=1)
    in_specs += [pl.BlockSpec((1, H), lambda b: (0, 0))] * 2                      # gamma, beta

    scratch_shapes = []
    if num_layers > 1:
        scratch_shapes.append(pltpu.VMEM((T, b_block, 4 * H), jnp.float32))       # next-layer gates

    # Explicit VMEM limit sized from the real resident footprint (with headroom).
    weight_elems = (2 * num_layers - 1) * H * 4 * H
    act_elems = 2 * T * b_block * 4 * H          # xg0 block (+ buffering) + xg_scr
    misc_elems = num_layers * 4 * H + 2 * H + b_block * H
    vmem_limit = int(4 * (2 * (weight_elems + act_elems) + misc_elems))
    vmem_limit = min(max(vmem_limit, 32 << 20), 100 << 20)

    out = pl.pallas_call(
        kernel,
        out_shape=jax.ShapeDtypeStruct((B_pad, H), jnp.float32),
        grid_spec=pltpu.PrefetchScalarGridSpec(
            num_scalar_prefetch=0,
            grid=(num_b_blocks,),
            in_specs=in_specs,
            out_specs=pl.BlockSpec((b_block, H), lambda b: (b, 0)),
            scratch_shapes=scratch_shapes,
        ),
        compiler_params=pltpu.CompilerParams(
            dimension_semantics=("parallel",),        # batch blocks are independent
            vmem_limit_bytes=vmem_limit,
        ),
    )(xg0, *wih_rest, *whh_all, *b_rest, gamma, beta)

    return out[:B] if B_pad != B else out


# --------------------------------- params -------------------------------------
def init_params(key, input_size, hidden_size, num_layers):
    """Deterministic init matching PyTorch nn.LSTM parameter shapes."""
    params = {"layers": []}
    k = 1.0 / jnp.sqrt(hidden_size)
    for layer in range(num_layers):
        d_in = input_size if layer == 0 else hidden_size
        key, k1, k2, k3, k4 = jax.random.split(key, 5)
        wih = jax.random.uniform(k1, (4 * hidden_size, d_in), jnp.float32, -k, k)
        whh = jax.random.uniform(k2, (4 * hidden_size, hidden_size), jnp.float32, -k, k)
        bih = jax.random.uniform(k3, (4 * hidden_size,), jnp.float32, -k, k)
        bhh = jax.random.uniform(k4, (4 * hidden_size,), jnp.float32, -k, k)
        params["layers"].append((wih, whh, bih, bhh))
    params["ln_gamma"] = jnp.ones((hidden_size,), jnp.float32)
    params["ln_beta"] = jnp.zeros((hidden_size,), jnp.float32)
    return params


# ------------------------------ pure-JAX reference -----------------------------
def _ref_forward(x_btd, params):
    x_tmd = jnp.transpose(x_btd, (1, 0, 2)).astype(jnp.float32)
    for (wih, whh, bih, bhh) in params["layers"]:
        H = whh.shape[1]
        B = x_tmd.shape[1]

        def step(carry, x_t):
            h, c = carry
            gates = x_t @ wih.T + h @ whh.T + bih + bhh
            i = jax.nn.sigmoid(gates[:, :H])
            f = jax.nn.sigmoid(gates[:, H:2 * H])
            g = jnp.tanh(gates[:, 2 * H:3 * H])
            o = jax.nn.sigmoid(gates[:, 3 * H:])
            c = f * c + i * g
            h = o * jnp.tanh(c)
            return (h, c), h

        (_, _), hs = jax.lax.scan(
            step, (jnp.zeros((B, H), jnp.float32), jnp.zeros((B, H), jnp.float32)), x_tmd)
        x_tmd = hs
    h_last = x_tmd[-1]
    mean = jnp.mean(h_last, axis=-1, keepdims=True)
    var = jnp.mean((h_last - mean) ** 2, axis=-1, keepdims=True)
    return (h_last - mean) * jax.lax.rsqrt(var + 1e-5) * params["ln_gamma"] + params["ln_beta"]


# ----------------------------------- test --------------------------------------
if __name__ == "__main__":
    B, T, input_size, hidden_size, num_layers = 2, 8, 32, 32, 2

    key = jax.random.PRNGKey(0)
    key, kx = jax.random.split(key)
    x = jax.random.normal(kx, (B, T, input_size), jnp.float32)
    params = init_params(key, input_size, hidden_size, num_layers)

    fwd = jax.jit(lstm_model_forward)
    out = jax.block_until_ready(fwd(x, params))
    ref = jax.block_until_ready(_ref_forward(x, params))

    assert out.shape == (B, hidden_size)
    assert jnp.allclose(out, ref, atol=1e-4, rtol=1e-4), "Pallas LSTM mismatch vs reference"
    print("KERNEL_OK")
</pallas_src>

<mosaic_0001>
module attributes {stable_mosaic.version = 11 : i64} {
  func.func @kernel(%arg0: i32, %arg1: memref<8x8x128xf32, #tpu.memory_space<vmem>>, %arg2: memref<32x128xf32, #tpu.memory_space<vmem>>, %arg3: memref<32x128xf32, #tpu.memory_space<vmem>>, %arg4: memref<32x128xf32, #tpu.memory_space<vmem>>, %arg5: memref<1x128xf32, #tpu.memory_space<vmem>>, %arg6: memref<1x32xf32, #tpu.memory_space<vmem>>, %arg7: memref<1x32xf32, #tpu.memory_space<vmem>>, %arg8: memref<8x32xf32, #tpu.memory_space<vmem>>, %arg9: memref<8x8x128xf32, #tpu.memory_space<vmem>>) attributes {dimension_semantics = [#tpu.dimension_semantics<parallel>], iteration_bounds = array<i64: 1>, scalar_prefetch = 0 : i64, scratch_operands = 1 : i64, tpu.core_type = #tpu.core_type<tc>, window_params = [{transform_indices = @transform_0, window_bounds = array<i64: 8, 8, 128>}, {pipeline_mode = #tpu.pipeline_mode<synchronous>, transform_indices = @transform_1, window_bounds = array<i64: 32, 128>}, {pipeline_mode = #tpu.pipeline_mode<synchronous>, transform_indices = @transform_2, window_bounds = array<i64: 32, 128>}, {pipeline_mode = #tpu.pipeline_mode<synchronous>, transform_indices = @transform_3, window_bounds = array<i64: 32, 128>}, {pipeline_mode = #tpu.pipeline_mode<synchronous>, transform_indices = @transform_4, window_bounds = array<i64: 1, 128>}, {pipeline_mode = #tpu.pipeline_mode<synchronous>, transform_indices = @transform_5, window_bounds = array<i64: 1, 32>}, {pipeline_mode = #tpu.pipeline_mode<synchronous>, transform_indices = @transform_6, window_bounds = array<i64: 1, 32>}, {transform_indices = @transform_7, window_bounds = array<i64: 8, 32>}]} {
    %c0 = arith.constant 0 : index
    %c0_0 = arith.constant 0 : index
    %0 = vector.load %arg3[%c0, %c0_0] : memref<32x128xf32, #tpu.memory_space<vmem>>, vector<32x128xf32>
    %c0_1 = arith.constant 0 : index
    %c0_2 = arith.constant 0 : index
    %1 = vector.load %arg2[%c0_1, %c0_2] : memref<32x128xf32, #tpu.memory_space<vmem>>, vector<32x128xf32>
    %c0_3 = arith.constant 0 : index
    %c0_4 = arith.constant 0 : index
    %2 = vector.load %arg5[%c0_3, %c0_4] : memref<1x128xf32, #tpu.memory_space<vmem>>, vector<1x128xf32>
    %3 = vector.shape_cast %2 : vector<1x128xf32> to vector<1x128xf32>
    %4 = vector.broadcast %3 : vector<1x128xf32> to vector<8x128xf32>
    %cst = arith.constant 0.000000e+00 : f32
    %5 = vector.broadcast %cst : f32 to vector<8x32xf32>
    %cst_5 = arith.constant 0.000000e+00 : f32
    %6 = vector.broadcast %cst_5 : f32 to vector<8x32xf32>
    %c0_6 = arith.constant 0 : index
    %c0_7 = arith.constant 0 : index
    %c0_8 = arith.constant 0 : index
    %7 = vector.load %arg1[%c0_6, %c0_7, %c0_8] : memref<8x8x128xf32, #tpu.memory_space<vmem>>, vector<1x8x128xf32>
    %8 = vector.shape_cast %7 : vector<1x8x128xf32> to vector<8x128xf32>
    %cst_9 = arith.constant dense<0.000000e+00> : vector<8x128xf32>
    %9 = tpu.matmul %5, %0, %cst_9 {dimension_numbers = #tpu.dot_dimension_numbers<[1], [0], [0], [1], [0, 0, 1, 1], [], []>} : vector<8x32xf32>, vector<32x128xf32>, vector<8x128xf32> -> vector<8x128xf32>
    %10 = arith.addf %8, %9 : vector<8x128xf32>
    %11 = vector.extract_strided_slice %10 {offsets = [0, 0], sizes = [8, 96], strides = [1, 1]} : vector<8x128xf32> to vector<8x96xf32>
    %12 = arith.negf %11 : vector<8x96xf32>
    %13 = math.exp %12 : vector<8x96xf32>
    %cst_10 = arith.constant 1.000000e+00 : f32
    %14 = vector.broadcast %cst_10 : f32 to vector<8x96xf32>
    %15 = arith.addf %14, %13 : vector<8x96xf32>
    %16 = arith.divf %14, %15 : vector<8x96xf32>
    %17 = vector.extract_strided_slice %16 {offsets = [0, 0], sizes = [8, 32], strides = [1, 1]} : vector<8x96xf32> to vector<8x32xf32>
    %18 = vector.extract_strided_slice %16 {offsets = [0, 32], sizes = [8, 32], strides = [1, 1]} : vector<8x96xf32> to vector<8x32xf32>
    %19 = vector.extract_strided_slice %16 {offsets = [0, 64], sizes = [8, 32], strides = [1, 1]} : vector<8x96xf32> to vector<8x32xf32>
    %20 = vector.extract_strided_slice %10 {offsets = [0, 96], sizes = [8, 32], strides = [1, 1]} : vector<8x128xf32> to vector<8x32xf32>
    %21 = math.tanh %20 : vector<8x32xf32>
    %22 = arith.mulf %18, %6 : vector<8x32xf32>
    %23 = arith.mulf %17, %21 : vector<8x32xf32>
    %24 = arith.addf %22, %23 : vector<8x32xf32>
    %25 = math.tanh %24 : vector<8x32xf32>
    %26 = arith.mulf %19, %25 : vector<8x32xf32>
    %cst_11 = arith.constant dense<0.000000e+00> : vector<8x128xf32>
    %27 = tpu.matmul %26, %1, %cst_11 {dimension_numbers = #tpu.dot_dimension_numbers<[1], [0], [0], [1], [0, 0, 1, 1], [], []>} : vector<8x32xf32>, vector<32x128xf32>, vector<8x128xf32> -> vector<8x128xf32>
    %28 = arith.addf %27, %4 : vector<8x128xf32>
    %c0_12 = arith.constant 0 : index
    %c0_13 = arith.constant 0 : index
    %c0_14 = arith.constant 0 : index
    %29 = vector.load %arg9[%c0_12, %c0_13, %c0_14] : memref<8x8x128xf32, #tpu.memory_space<vmem>>, vector<1x8x128xf32>
    %30 = vector.shape_cast %29 : vector<1x8x128xf32> to vector<8x128xf32>
    %31 = vector.shape_cast %28 : vector<8x128xf32> to vector<1x8x128xf32>
    tpu.vector_store %arg9[%c0_12, %c0_13, %c0_14], %31 {strides = array<i32>} : memref<8x8x128xf32, #tpu.memory_space<vmem>>, vector<1x8x128xf32>,
    %c1 = arith.constant 1 : index
    %c0_15 = arith.constant 0 : index
    %c0_16 = arith.constant 0 : index
    %32 = vector.load %arg1[%c1, %c0_15, %c0_16] : memref<8x8x128xf32, #tpu.memory_space<vmem>>, vector<1x8x128xf32>
    %33 = vector.shape_cast %32 : vector<1x8x128xf32> to vector<8x128xf32>
    %cst_17 = arith.constant dense<0.000000e+00> : vector<8x128xf32>
    %34 = tpu.matmul %26, %0, %cst_17 {dimension_numbers = #tpu.dot_dimension_numbers<[1], [0], [0], [1], [0, 0, 1, 1], [], []>} : vector<8x32xf32>, vector<32x128xf32>, vector<8x128xf32> -> vector<8x128xf32>
    %35 = arith.addf %33, %34 : vector<8x128xf32>
    %36 = vector.extract_strided_slice %35 {offsets = [0, 0], sizes = [8, 96], strides = [1, 1]} : vector<8x128xf32> to vector<8x96xf32>
    %37 = arith.negf %36 : vector<8x96xf32>
    %38 = math.exp %37 : vector<8x96xf32>
    %cst_18 = arith.constant 1.000000e+00 : f32
    %39 = vector.broadcast %cst_18 : f32 to vector<8x96xf32>
    %40 = arith.addf %39, %38 : vector<8x96xf32>
    %41 = arith.divf %39, %40 : vector<8x96xf32>
    %42 = vector.extract_strided_slice %41 {offsets = [0, 0], sizes = [8, 32], strides = [1, 1]} : vector<8x96xf32> to vector<8x32xf32>
    %43 = vector.extract_strided_slice %41 {offsets = [0, 32], sizes = [8, 32], strides = [1, 1]} : vector<8x96xf32> to vector<8x32xf32>
    %44 = vector.extract_strided_slice %41 {offsets = [0, 64], sizes = [8, 32], strides = [1, 1]} : vector<8x96xf32> to vector<8x32xf32>
    %45 = vector.extract_strided_slice %35 {offsets = [0, 96], sizes = [8, 32], strides = [1, 1]} : vector<8x128xf32> to vector<8x32xf32>
    %46 = math.tanh %45 : vector<8x32xf32>
    %47 = arith.mulf %43, %24 : vector<8x32xf32>
    %48 = arith.mulf %42, %46 : vector<8x32xf32>
    %49 = arith.addf %47, %48 : vector<8x32xf32>
    %50 = math.tanh %49 : vector<8x32xf32>
    %51 = arith.mulf %44, %50 : vector<8x32xf32>
    %cst_19 = arith.constant dense<0.000000e+00> : vector<8x128xf32>
    %52 = tpu.matmul %51, %1, %cst_19 {dimension_numbers = #tpu.dot_dimension_numbers<[1], [0], [0], [1], [0, 0, 1, 1], [], []>} : vector<8x32xf32>, vector<32x128xf32>, vector<8x128xf32> -> vector<8x128xf32>
    %53 = arith.addf %52, %4 : vector<8x128xf32>
    %c1_20 = arith.constant 1 : index
    %c0_21 = arith.constant 0 : index
    %c0_22 = arith.constant 0 : index
    %54 = vector.load %arg9[%c1_20, %c0_21, %c0_22] : memref<8x8x128xf32, #tpu.memory_space<vmem>>, vector<1x8x128xf32>
    %55 = vector.shape_cast %54 : vector<1x8x128xf32> to vector<8x128xf32>
    %56 = vector.shape_cast %53 : vector<8x128xf32> to vector<1x8x128xf32>
    tpu.vector_store %arg9[%c1_20, %c0_21, %c0_22], %56 {strides = array<i32>} : memref<8x8x128xf32, #tpu.memory_space<vmem>>, vector<1x8x128xf32>,
    %c2 = arith.constant 2 : index
    %c0_23 = arith.constant 0 : index
    %c0_24 = arith.constant 0 : index
    %57 = vector.load %arg1[%c2, %c0_23, %c0_24] : memref<8x8x128xf32, #tpu.memory_space<vmem>>, vector<1x8x128xf32>
    %58 = vector.shape_cast %57 : vector<1x8x128xf32> to vector<8x128xf32>
    %cst_25 = arith.constant dense<0.000000e+00> : vector<8x128xf32>
    %59 = tpu.matmul %51, %0, %cst_25 {dimension_numbers = #tpu.dot_dimension_numbers<[1], [0], [0], [1], [0, 0, 1, 1], [], []>} : vector<8x32xf32>, vector<32x128xf32>, vector<8x128xf32> -> vector<8x128xf32>
    %60 = arith.addf %58, %59 : vector<8x128xf32>
    %61 = vector.extract_strided_slice %60 {offsets = [0, 0], sizes = [8, 96], strides = [1, 1]} : vector<8x128xf32> to vector<8x96xf32>
    %62 = arith.negf %61 : vector<8x96xf32>
    %63 = math.exp %62 : vector<8x96xf32>
    %cst_26 = arith.constant 1.000000e+00 : f32
    %64 = vector.broadcast %cst_26 : f32 to vector<8x96xf32>
    %65 = arith.addf %64, %63 : vector<8x96xf32>
    %66 = arith.divf %64, %65 : vector<8x96xf32>
    %67 = vector.extract_strided_slice %66 {offsets = [0, 0], sizes = [8, 32], strides = [1, 1]} : vector<8x96xf32> to vector<8x32xf32>
    %68 = vector.extract_strided_slice %66 {offsets = [0, 32], sizes = [8, 32], strides = [1, 1]} : vector<8x96xf32> to vector<8x32xf32>
    %69 = vector.extract_strided_slice %66 {offsets = [0, 64], sizes = [8, 32], strides = [1, 1]} : vector<8x96xf32> to vector<8x32xf32>
    %70 = vector.extract_strided_slice %60 {offsets = [0, 96], sizes = [8, 32], strides = [1, 1]} : vector<8x128xf32> to vector<8x32xf32>
    %71 = math.tanh %70 : vector<8x32xf32>
    %72 = arith.mulf %68, %49 : vector<8x32xf32>
    %73 = arith.mulf %67, %71 : vector<8x32xf32>
    %74 = arith.addf %72, %73 : vector<8x32xf32>
    %75 = math.tanh %74 : vector<8x32xf32>
    %76 = arith.mulf %69, %75 : vector<8x32xf32>
    %cst_27 = arith.constant dense<0.000000e+00> : vector<8x128xf32>
    %77 = tpu.matmul %76, %1, %cst_27 {dimension_numbers = #tpu.dot_dimension_numbers<[1], [0], [0], [1], [0, 0, 1, 1], [], []>} : vector<8x32xf32>, vector<32x128xf32>, vector<8x128xf32> -> vector<8x128xf32>
    %78 = arith.addf %77, %4 : vector<8x128xf32>
    %c2_28 = arith.constant 2 : index
    %c0_29 = arith.constant 0 : index
    %c0_30 = arith.constant 0 : index
    %79 = vector.load %arg9[%c2_28, %c0_29, %c0_30] : memref<8x8x128xf32, #tpu.memory_space<vmem>>, vector<1x8x128xf32>
    %80 = vector.shape_cast %79 : vector<1x8x128xf32> to vector<8x128xf32>
    %81 = vector.shape_cast %78 : vector<8x128xf32> to vector<1x8x128xf32>
    tpu.vector_store %arg9[%c2_28, %c0_29, %c0_30], %81 {strides = array<i32>} : memref<8x8x128xf32, #tpu.memory_space<vmem>>, vector<1x8x128xf32>,
    %c3 = arith.constant 3 : index
    %c0_31 = arith.constant 0 : index
    %c0_32 = arith.constant 0 : index
    %82 = vector.load %arg1[%c3, %c0_31, %c0_32] : memref<8x8x128xf32, #tpu.memory_space<vmem>>, vector<1x8x128xf32>
    %83 = vector.shape_cast %82 : vector<1x8x128xf32> to vector<8x128xf32>
    %cst_33 = arith.constant dense<0.000000e+00> : vector<8x128xf32>
    %84 = tpu.matmul %76, %0, %cst_33 {dimension_numbers = #tpu.dot_dimension_numbers<[1], [0], [0], [1], [0, 0, 1, 1], [], []>} : vector<8x32xf32>, vector<32x128xf32>, vector<8x128xf32> -> vector<8x128xf32>
    %85 = arith.addf %83, %84 : vector<8x128xf32>
    %86 = vector.extract_strided_slice %85 {offsets = [0, 0], sizes = [8, 96], strides = [1, 1]} : vector<8x128xf32> to vector<8x96xf32>
    %87 = arith.negf %86 : vector<8x96xf32>
    %88 = math.exp %87 : vector<8x96xf32>
    %cst_34 = arith.constant 1.000000e+00 : f32
    %89 = vector.broadcast %cst_34 : f32 to vector<8x96xf32>
    %90 = arith.addf %89, %88 : vector<8x96xf32>
    %91 = arith.divf %89, %90 : vector<8x96xf32>
    %92 = vector.extract_strided_slice %91 {offsets = [0, 0], sizes = [8, 32], strides = [1, 1]} : vector<8x96xf32> to vector<8x32xf32>
    %93 = vector.extract_strided_slice %91 {offsets = [0, 32], sizes = [8, 32], strides = [1, 1]} : vector<8x96xf32> to vector<8x32xf32>
    %94 = vector.extract_strided_slice %91 {offsets = [0, 64], sizes = [8, 32], strides = [1, 1]} : vector<8x96xf32> to vector<8x32xf32>
    %95 = vector.extract_strided_slice %85 {offsets = [0, 96], sizes = [8, 32], strides = [1, 1]} : vector<8x128xf32> to vector<8x32xf32>
    %96 = math.tanh %95 : vector<8x32xf32>
    %97 = arith.mulf %93, %74 : vector<8x32xf32>
    %98 = arith.mulf %92, %96 : vector<8x32xf32>
    %99 = arith.addf %97, %98 : vector<8x32xf32>
    %100 = math.tanh %99 : vector<8x32xf32>
    %101 = arith.mulf %94, %100 : vector<8x32xf32>
    %cst_35 = arith.constant dense<0.000000e+00> : vector<8x128xf32>
    %102 = tpu.matmul %101, %1, %cst_35 {dimension_numbers = #tpu.dot_dimension_numbers<[1], [0], [0], [1], [0, 0, 1, 1], [], []>} : vector<8x32xf32>, vector<32x128xf32>, vector<8x128xf32> -> vector<8x128xf32>
    %103 = arith.addf %102, %4 : vector<8x128xf32>
    %c3_36 = arith.constant 3 : index
    %c0_37 = arith.constant 0 : index
    %c0_38 = arith.constant 0 : index
    %104 = vector.load %arg9[%c3_36, %c0_37, %c0_38] : memref<8x8x128xf32, #tpu.memory_space<vmem>>, vector<1x8x128xf32>
    %105 = vector.shape_cast %104 : vector<1x8x128xf32> to vector<8x128xf32>
    %106 = vector.shape_cast %103 : vector<8x128xf32> to vector<1x8x128xf32>
    tpu.vector_store %arg9[%c3_36, %c0_37, %c0_38], %106 {strides = array<i32>} : memref<8x8x128xf32, #tpu.memory_space<vmem>>, vector<1x8x128xf32>,
    %c4 = arith.constant 4 : index
    %c0_39 = arith.constant 0 : index
    %c0_40 = arith.constant 0 : index
    %107 = vector.load %arg1[%c4, %c0_39, %c0_40] : memref<8x8x128xf32, #tpu.memory_space<vmem>>, vector<1x8x128xf32>
    %108 = vector.shape_cast %107 : vector<1x8x128xf32> to vector<8x128xf32>
    %cst_41 = arith.constant dense<0.000000e+00> : vector<8x128xf32>
    %109 = tpu.matmul %101, %0, %cst_41 {dimension_numbers = #tpu.dot_dimension_numbers<[1], [0], [0], [1], [0, 0, 1, 1], [], []>} : vector<8x32xf32>, vector<32x128xf32>, vector<8x128xf32> -> vector<8x128xf32>
    %110 = arith.addf %108, %109 : vector<8x128xf32>
    %111 = vector.extract_strided_slice %110 {offsets = [0, 0], sizes = [8, 96], strides = [1, 1]} : vector<8x128xf32> to vector<8x96xf32>
    %112 = arith.negf %111 : vector<8x96xf32>
    %113 = math.exp %112 : vector<8x96xf32>
    %cst_42 = arith.constant 1.000000e+00 : f32
    %114 = vector.broadcast %cst_42 : f32 to vector<8x96xf32>
    %115 = arith.addf %114, %113 : vector<8x96xf32>
    %116 = arith.divf %114, %115 : vector<8x96xf32>
    %117 = vector.extract_strided_slice %116 {offsets = [0, 0], sizes = [8, 32], strides = [1, 1]} : vector<8x96xf32> to vector<8x32xf32>
    %118 = vector.extract_strided_slice %116 {offsets = [0, 32], sizes = [8, 32], strides = [1, 1]} : vector<8x96xf32> to vector<8x32xf32>
    %119 = vector.extract_strided_slice %116 {offsets = [0, 64], sizes = [8, 32], strides = [1, 1]} : vector<8x96xf32> to vector<8x32xf32>
    %120 = vector.extract_strided_slice %110 {offsets = [0, 96], sizes = [8, 32], strides = [1, 1]} : vector<8x128xf32> to vector<8x32xf32>
    %121 = math.tanh %120 : vector<8x32xf32>
    %122 = arith.mulf %118, %99 : vector<8x32xf32>
    %123 = arith.mulf %117, %121 : vector<8x32xf32>
    %124 = arith.addf %122, %123 : vector<8x32xf32>
    %125 = math.tanh %124 : vector<8x32xf32>
    %126 = arith.mulf %119, %125 : vector<8x32xf32>
    %cst_43 = arith.constant dense<0.000000e+00> : vector<8x128xf32>
    %127 = tpu.matmul %126, %1, %cst_43 {dimension_numbers = #tpu.dot_dimension_numbers<[1], [0], [0], [1], [0, 0, 1, 1], [], []>} : vector<8x32xf32>, vector<32x128xf32>, vector<8x128xf32> -> vector<8x128xf32>
    %128 = arith.addf %127, %4 : vector<8x128xf32>
    %c4_44 = arith.constant 4 : index
    %c0_45 = arith.constant 0 : index
    %c0_46 = arith.constant 0 : index
    %129 = vector.load %arg9[%c4_44, %c0_45, %c0_46] : memref<8x8x128xf32, #tpu.memory_space<vmem>>, vector<1x8x128xf32>
    %130 = vector.shape_cast %129 : vector<1x8x128xf32> to vector<8x128xf32>
    %131 = vector.shape_cast %128 : vector<8x128xf32> to vector<1x8x128xf32>
    tpu.vector_store %arg9[%c4_44, %c0_45, %c0_46], %131 {strides = array<i32>} : memref<8x8x128xf32, #tpu.memory_space<vmem>>, vector<1x8x128xf32>,
    %c5 = arith.constant 5 : index
    %c0_47 = arith.constant 0 : index
    %c0_48 = arith.constant 0 : index
    %132 = vector.load %arg1[%c5, %c0_47, %c0_48] : memref<8x8x128xf32, #tpu.memory_space<vmem>>, vector<1x8x128xf32>
    %133 = vector.shape_cast %132 : vector<1x8x128xf32> to vector<8x128xf32>
    %cst_49 = arith.constant dense<0.000000e+00> : vector<8x128xf32>
    %134 = tpu.matmul %126, %0, %cst_49 {dimension_numbers = #tpu.dot_dimension_numbers<[1], [0], [0], [1], [0, 0, 1, 1], [], []>} : vector<8x32xf32>, vector<32x128xf32>, vector<8x128xf32> -> vector<8x128xf32>
    %135 = arith.addf %133, %134 : vector<8x128xf32>
    %136 = vector.extract_strided_slice %135 {offsets = [0, 0], sizes = [8, 96], strides = [1, 1]} : vector<8x128xf32> to vector<8x96xf32>
    %137 = arith.negf %136 : vector<8x96xf32>
    %138 = math.exp %137 : vector<8x96xf32>
    %cst_50 = arith.constant 1.000000e+00 : f32
    %139 = vector.broadcast %cst_50 : f32 to vector<8x96xf32>
    %140 = arith.addf %139, %138 : vector<8x96xf32>
    %141 = arith.divf %139, %140 : vector<8x96xf32>
    %142 = vector.extract_strided_slice %141 {offsets = [0, 0], sizes = [8, 32], strides = [1, 1]} : vector<8x96xf32> to vector<8x32xf32>
    %143 = vector.extract_strided_slice %141 {offsets = [0, 32], sizes = [8, 32], strides = [1, 1]} : vector<8x96xf32> to vector<8x32xf32>
    %144 = vector.extract_strided_slice %141 {offsets = [0, 64], sizes = [8, 32], strides = [1, 1]} : vector<8x96xf32> to vector<8x32xf32>
    %145 = vector.extract_strided_slice %135 {offsets = [0, 96], sizes = [8, 32], strides = [1, 1]} : vector<8x128xf32> to vector<8x32xf32>
    %146 = math.tanh %145 : vector<8x32xf32>
    %147 = arith.mulf %143, %124 : vector<8x32xf32>
    %148 = arith.mulf %142, %146 : vector<8x32xf32>
    %149 = arith.addf %147, %148 : vector<8x32xf32>
    %150 = math.tanh %149 : vector<8x32xf32>
    %151 = arith.mulf %144, %150 : vector<8x32xf32>
    %cst_51 = arith.constant dense<0.000000e+00> : vector<8x128xf32>
    %152 = tpu.matmul %151, %1, %cst_51 {dimension_numbers = #tpu.dot_dimension_numbers<[1], [0], [0], [1], [0, 0, 1, 1], [], []>} : vector<8x32xf32>, vector<32x128xf32>, vector<8x128xf32> -> vector<8x128xf32>
    %153 = arith.addf %152, %4 : vector<8x128xf32>
    %c5_52 = arith.constant 5 : index
    %c0_53 = arith.constant 0 : index
    %c0_54 = arith.constant 0 : index
    %154 = vector.load %arg9[%c5_52, %c0_53, %c0_54] : memref<8x8x128xf32, #tpu.memory_space<vmem>>, vector<1x8x128xf32>
    %155 = vector.shape_cast %154 : vector<1x8x128xf32> to vector<8x128xf32>
    %156 = vector.shape_cast %153 : vector<8x128xf32> to vector<1x8x128xf32>
    tpu.vector_store %arg9[%c5_52, %c0_53, %c0_54], %156 {strides = array<i32>} : memref<8x8x128xf32, #tpu.memory_space<vmem>>, vector<1x8x128xf32>,
    %c6 = arith.constant 6 : index
    %c0_55 = arith.constant 0 : index
    %c0_56 = arith.constant 0 : index
    %157 = vector.load %arg1[%c6, %c0_55, %c0_56] : memref<8x8x128xf32, #tpu.memory_space<vmem>>, vector<1x8x128xf32>
    %158 = vector.shape_cast %157 : vector<1x8x128xf32> to vector<8x128xf32>
    %cst_57 = arith.constant dense<0.000000e+00> : vector<8x128xf32>
    %159 = tpu.matmul %151, %0, %cst_57 {dimension_numbers = #tpu.dot_dimension_numbers<[1], [0], [0], [1], [0, 0, 1, 1], [], []>} : vector<8x32xf32>, vector<32x128xf32>, vector<8x128xf32> -> vector<8x128xf32>
    %160 = arith.addf %158, %159 : vector<8x128xf32>
    %161 = vector.extract_strided_slice %160 {offsets = [0, 0], sizes = [8, 96], strides = [1, 1]} : vector<8x128xf32> to vector<8x96xf32>
    %162 = arith.negf %161 : vector<8x96xf32>
    %163 = math.exp %162 : vector<8x96xf32>
    %cst_58 = arith.constant 1.000000e+00 : f32
    %164 = vector.broadcast %cst_58 : f32 to vector<8x96xf32>
    %165 = arith.addf %164, %163 : vector<8x96xf32>
    %166 = arith.divf %164, %165 : vector<8x96xf32>
    %167 = vector.extract_strided_slice %166 {offsets = [0, 0], sizes = [8, 32], strides = [1, 1]} : vector<8x96xf32> to vector<8x32xf32>
    %168 = vector.extract_strided_slice %166 {offsets = [0, 32], sizes = [8, 32], strides = [1, 1]} : vector<8x96xf32> to vector<8x32xf32>
    %169 = vector.extract_strided_slice %166 {offsets = [0, 64], sizes = [8, 32], strides = [1, 1]} : vector<8x96xf32> to vector<8x32xf32>
    %170 = vector.extract_strided_slice %160 {offsets = [0, 96], sizes = [8, 32], strides = [1, 1]} : vector<8x128xf32> to vector<8x32xf32>
    %171 = math.tanh %170 : vector<8x32xf32>
    %172 = arith.mulf %168, %149 : vector<8x32xf32>
    %173 = arith.mulf %167, %171 : vector<8x32xf32>
    %174 = arith.addf %172, %173 : vector<8x32xf32>
    %175 = math.tanh %174 : vector<8x32xf32>
    %176 = arith.mulf %169, %175 : vector<8x32xf32>
    %cst_59 = arith.constant dense<0.000000e+00> : vector<8x128xf32>
    %177 = tpu.matmul %176, %1, %cst_59 {dimension_numbers = #tpu.dot_dimension_numbers<[1], [0], [0], [1], [0, 0, 1, 1], [], []>} : vector<8x32xf32>, vector<32x128xf32>, vector<8x128xf32> -> vector<8x128xf32>
    %178 = arith.addf %177, %4 : vector<8x128xf32>
    %c6_60 = arith.constant 6 : index
    %c0_61 = arith.constant 0 : index
    %c0_62 = arith.constant 0 : index
    %179 = vector.load %arg9[%c6_60, %c0_61, %c0_62] : memref<8x8x128xf32, #tpu.memory_space<vmem>>, vector<1x8x128xf32>
    %180 = vector.shape_cast %179 : vector<1x8x128xf32> to vector<8x128xf32>
    %181 = vector.shape_cast %178 : vector<8x128xf32> to vector<1x8x128xf32>
    tpu.vector_store %arg9[%c6_60, %c0_61, %c0_62], %181 {strides = array<i32>} : memref<8x8x128xf32, #tpu.memory_space<vmem>>, vector<1x8x128xf32>,
    %c7 = arith.constant 7 : index
    %c0_63 = arith.constant 0 : index
    %c0_64 = arith.constant 0 : index
    %182 = vector.load %arg1[%c7, %c0_63, %c0_64] : memref<8x8x128xf32, #tpu.memory_space<vmem>>, vector<1x8x128xf32>
    %183 = vector.shape_cast %182 : vector<1x8x128xf32> to vector<8x128xf32>
    %cst_65 = arith.constant dense<0.000000e+00> : vector<8x128xf32>
    %184 = tpu.matmul %176, %0, %cst_65 {dimension_numbers = #tpu.dot_dimension_numbers<[1], [0], [0], [1], [0, 0, 1, 1], [], []>} : vector<8x32xf32>, vector<32x128xf32>, vector<8x128xf32> -> vector<8x128xf32>
    %185 = arith.addf %183, %184 : vector<8x128xf32>
    %186 = vector.extract_strided_slice %185 {offsets = [0, 0], sizes = [8, 96], strides = [1, 1]} : vector<8x128xf32> to vector<8x96xf32>
    %187 = arith.negf %186 : vector<8x96xf32>
    %188 = math.exp %187 : vector<8x96xf32>
    %cst_66 = arith.constant 1.000000e+00 : f32
    %189 = vector.broadcast %cst_66 : f32 to vector<8x96xf32>
    %190 = arith.addf %189, %188 : vector<8x96xf32>
    %191 = arith.divf %189, %190 : vector<8x96xf32>
    %192 = vector.extract_strided_slice %191 {offsets = [0, 0], sizes = [8, 32], strides = [1, 1]} : vector<8x96xf32> to vector<8x32xf32>
    %193 = vector.extract_strided_slice %191 {offsets = [0, 32], sizes = [8, 32], strides = [1, 1]} : vector<8x96xf32> to vector<8x32xf32>
    %194 = vector.extract_strided_slice %191 {offsets = [0, 64], sizes = [8, 32], strides = [1, 1]} : vector<8x96xf32> to vector<8x32xf32>
    %195 = vector.extract_strided_slice %185 {offsets = [0, 96], sizes = [8, 32], strides = [1, 1]} : vector<8x128xf32> to vector<8x32xf32>
    %196 = math.tanh %195 : vector<8x32xf32>
    %197 = arith.mulf %193, %174 : vector<8x32xf32>
    %198 = arith.mulf %192, %196 : vector<8x32xf32>
    %199 = arith.addf %197, %198 : vector<8x32xf32>
    %200 = math.tanh %199 : vector<8x32xf32>
    %201 = arith.mulf %194, %200 : vector<8x32xf32>
    %cst_67 = arith.constant dense<0.000000e+00> : vector<8x128xf32>
    %202 = tpu.matmul %201, %1, %cst_67 {dimension_numbers = #tpu.dot_dimension_numbers<[1], [0], [0], [1], [0, 0, 1, 1], [], []>} : vector<8x32xf32>, vector<32x128xf32>, vector<8x128xf32> -> vector<8x128xf32>
    %203 = arith.addf %202, %4 : vector<8x128xf32>
    %c7_68 = arith.constant 7 : index
    %c0_69 = arith.constant 0 : index
    %c0_70 = arith.constant 0 : index
    %204 = vector.load %arg9[%c7_68, %c0_69, %c0_70] : memref<8x8x128xf32, #tpu.memory_space<vmem>>, vector<1x8x128xf32>
    %205 = vector.shape_cast %204 : vector<1x8x128xf32> to vector<8x128xf32>
    %206 = vector.shape_cast %203 : vector<8x128xf32> to vector<1x8x128xf32>
    tpu.vector_store %arg9[%c7_68, %c0_69, %c0_70], %206 {strides = array<i32>} : memref<8x8x128xf32, #tpu.memory_space<vmem>>, vector<1x8x128xf32>,
    %c0_71 = arith.constant 0 : index
    %c0_72 = arith.constant 0 : index
    %207 = vector.load %arg4[%c0_71, %c0_72] : memref<32x128xf32, #tpu.memory_space<vmem>>, vector<32x128xf32>
    %cst_73 = arith.constant 0.000000e+00 : f32
    %208 = vector.broadcast %cst_73 : f32 to vector<8x32xf32>
    %cst_74 = arith.constant 0.000000e+00 : f32
    %209 = vector.broadcast %cst_74 : f32 to vector<8x32xf32>
    %c0_75 = arith.constant 0 : index
    %c0_76 = arith.constant 0 : index
    %c0_77 = arith.constant 0 : index
    %210 = vector.load %arg9[%c0_75, %c0_76, %c0_77] : memref<8x8x128xf32, #tpu.memory_space<vmem>>, vector<1x8x128xf32>
    %211 = vector.shape_cast %210 : vector<1x8x128xf32> to vector<8x128xf32>
    %cst_78 = arith.constant dense<0.000000e+00> : vector<8x128xf32>
    %212 = tpu.matmul %208, %207, %cst_78 {dimension_numbers = #tpu.dot_dimension_numbers<[1], [0], [0], [1], [0, 0, 1, 1], [], []>} : vector<8x32xf32>, vector<32x128xf32>, vector<8x128xf32> -> vector<8x128xf32>
    %213 = arith.addf %211, %212 : vector<8x128xf32>
    %214 = vector.extract_strided_slice %213 {offsets = [0, 0], sizes = [8, 96], strides = [1, 1]} : vector<8x128xf32> to vector<8x96xf32>
    %215 = arith.negf %214 : vector<8x96xf32>
    %216 = math.exp %215 : vector<8x96xf32>
    %cst_79 = arith.constant 1.000000e+00 : f32
    %217 = vector.broadcast %cst_79 : f32 to vector<8x96xf32>
    %218 = arith.addf %217, %216 : vector<8x96xf32>
    %219 = arith.divf %217, %218 : vector<8x96xf32>
    %220 = vector.extract_strided_slice %219 {offsets = [0, 0], sizes = [8, 32], strides = [1, 1]} : vector<8x96xf32> to vector<8x32xf32>
    %221 = vector.extract_strided_slice %219 {offsets = [0, 32], sizes = [8, 32], strides = [1, 1]} : vector<8x96xf32> to vector<8x32xf32>
    %222 = vector.extract_strided_slice %219 {offsets = [0, 64], sizes = [8, 32], strides = [1, 1]} : vector<8x96xf32> to vector<8x32xf32>
    %223 = vector.extract_strided_slice %213 {offsets = [0, 96], sizes = [8, 32], strides = [1, 1]} : vector<8x128xf32> to vector<8x32xf32>
    %224 = math.tanh %223 : vector<8x32xf32>
    %225 = arith.mulf %221, %209 : vector<8x32xf32>
    %226 = arith.mulf %220, %224 : vector<8x32xf32>
    %227 = arith.addf %225, %226 : vector<8x32xf32>
    %228 = math.tanh %227 : vector<8x32xf32>
    %229 = arith.mulf %222, %228 : vector<8x32xf32>
    %c1_80 = arith.constant 1 : index
    %c0_81 = arith.constant 0 : index
    %c0_82 = arith.constant 0 : index
    %230 = vector.load %arg9[%c1_80, %c0_81, %c0_82] : memref<8x8x128xf32, #tpu.memory_space<vmem>>, vector<1x8x128xf32>
    %231 = vector.shape_cast %230 : vector<1x8x128xf32> to vector<8x128xf32>
    %cst_83 = arith.constant dense<0.000000e+00> : vector<8x128xf32>
    %232 = tpu.matmul %229, %207, %cst_83 {dimension_numbers = #tpu.dot_dimension_numbers<[1], [0], [0], [1], [0, 0, 1, 1], [], []>} : vector<8x32xf32>, vector<32x128xf32>, vector<8x128xf32> -> vector<8x128xf32>
    %233 = arith.addf %231, %232 : vector<8x128xf32>
    %234 = vector.extract_strided_slice %233 {offsets = [0, 0], sizes = [8, 96], strides = [1, 1]} : vector<8x128xf32> to vector<8x96xf32>
    %235 = arith.negf %234 : vector<8x96xf32>
    %236 = math.exp %235 : vector<8x96xf32>
    %cst_84 = arith.constant 1.000000e+00 : f32
    %237 = vector.broadcast %cst_84 : f32 to vector<8x96xf32>
    %238 = arith.addf %237, %236 : vector<8x96xf32>
    %239 = arith.divf %237, %238 : vector<8x96xf32>
    %240 = vector.extract_strided_slice %239 {offsets = [0, 0], sizes = [8, 32], strides = [1, 1]} : vector<8x96xf32> to vector<8x32xf32>
    %241 = vector.extract_strided_slice %239 {offsets = [0, 32], sizes = [8, 32], strides = [1, 1]} : vector<8x96xf32> to vector<8x32xf32>
    %242 = vector.extract_strided_slice %239 {offsets = [0, 64], sizes = [8, 32], strides = [1, 1]} : vector<8x96xf32> to vector<8x32xf32>
    %243 = vector.extract_strided_slice %233 {offsets = [0, 96], sizes = [8, 32], strides = [1, 1]} : vector<8x128xf32> to vector<8x32xf32>
    %244 = math.tanh %243 : vector<8x32xf32>
    %245 = arith.mulf %241, %227 : vector<8x32xf32>
    %246 = arith.mulf %240, %244 : vector<8x32xf32>
    %247 = arith.addf %245, %246 : vector<8x32xf32>
    %248 = math.tanh %247 : vector<8x32xf32>
    %249 = arith.mulf %242, %248 : vector<8x32xf32>
    %c2_85 = arith.constant 2 : index
    %c0_86 = arith.constant 0 : index
    %c0_87 = arith.constant 0 : index
    %250 = vector.load %arg9[%c2_85, %c0_86, %c0_87] : memref<8x8x128xf32, #tpu.memory_space<vmem>>, vector<1x8x128xf32>
    %251 = vector.shape_cast %250 : vector<1x8x128xf32> to vector<8x128xf32>
    %cst_88 = arith.constant dense<0.000000e+00> : vector<8x128xf32>
    %252 = tpu.matmul %249, %207, %cst_88 {dimension_numbers = #tpu.dot_dimension_numbers<[1], [0], [0], [1], [0, 0, 1, 1], [], []>} : vector<8x32xf32>, vector<32x128xf32>, vector<8x128xf32> -> vector<8x128xf32>
    %253 = arith.addf %251, %252 : vector<8x128xf32>
    %254 = vector.extract_strided_slice %253 {offsets = [0, 0], sizes = [8, 96], strides = [1, 1]} : vector<8x128xf32> to vector<8x96xf32>
    %255 = arith.negf %254 : vector<8x96xf32>
    %256 = math.exp %255 : vector<8x96xf32>
    %cst_89 = arith.constant 1.000000e+00 : f32
    %257 = vector.broadcast %cst_89 : f32 to vector<8x96xf32>
    %258 = arith.addf %257, %256 : vector<8x96xf32>
    %259 = arith.divf %257, %258 : vector<8x96xf32>
    %260 = vector.extract_strided_slice %259 {offsets = [0, 0], sizes = [8, 32], strides = [1, 1]} : vector<8x96xf32> to vector<8x32xf32>
    %261 = vector.extract_strided_slice %259 {offsets = [0, 32], sizes = [8, 32], strides = [1, 1]} : vector<8x96xf32> to vector<8x32xf32>
    %262 = vector.extract_strided_slice %259 {offsets = [0, 64], sizes = [8, 32], strides = [1, 1]} : vector<8x96xf32> to vector<8x32xf32>
    %263 = vector.extract_strided_slice %253 {offsets = [0, 96], sizes = [8, 32], strides = [1, 1]} : vector<8x128xf32> to vector<8x32xf32>
    %264 = math.tanh %263 : vector<8x32xf32>
    %265 = arith.mulf %261, %247 : vector<8x32xf32>
    %266 = arith.mulf %260, %264 : vector<8x32xf32>
    %267 = arith.addf %265, %266 : vector<8x32xf32>
    %268 = math.tanh %267 : vector<8x32xf32>
    %269 = arith.mulf %262, %268 : vector<8x32xf32>
    %c3_90 = arith.constant 3 : index
    %c0_91 = arith.constant 0 : index
    %c0_92 = arith.constant 0 : index
    %270 = vector.load %arg9[%c3_90, %c0_91, %c0_92] : memref<8x8x128xf32, #tpu.memory_space<vmem>>, vector<1x8x128xf32>
    %271 = vector.shape_cast %270 : vector<1x8x128xf32> to vector<8x128xf32>
    %cst_93 = arith.constant dense<0.000000e+00> : vector<8x128xf32>
    %272 = tpu.matmul %269, %207, %cst_93 {dimension_numbers = #tpu.dot_dimension_numbers<[1], [0], [0], [1], [0, 0, 1, 1], [], []>} : vector<8x32xf32>, vector<32x128xf32>, vector<8x128xf32> -> vector<8x128xf32>
    %273 = arith.addf %271, %272 : vector<8x128xf32>
    %274 = vector.extract_strided_slice %273 {offsets = [0, 0], sizes = [8, 96], strides = [1, 1]} : vector<8x128xf32> to vector<8x96xf32>
    %275 = arith.negf %274 : vector<8x96xf32>
    %276 = math.exp %275 : vector<8x96xf32>
    %cst_94 = arith.constant 1.000000e+00 : f32
    %277 = vector.broadcast %cst_94 : f32 to vector<8x96xf32>
    %278 = arith.addf %277, %276 : vector<8x96xf32>
    %279 = arith.divf %277, %278 : vector<8x96xf32>
    %280 = vector.extract_strided_slice %279 {offsets = [0, 0], sizes = [8, 32], strides = [1, 1]} : vector<8x96xf32> to vector<8x32xf32>
    %281 = vector.extract_strided_slice %279 {offsets = [0, 32], sizes = [8, 32], strides = [1, 1]} : vector<8x96xf32> to vector<8x32xf32>
    %282 = vector.extract_strided_slice %279 {offsets = [0, 64], sizes = [8, 32], strides = [1, 1]} : vector<8x96xf32> to vector<8x32xf32>
    %283 = vector.extract_strided_slice %273 {offsets = [0, 96], sizes = [8, 32], strides = [1, 1]} : vector<8x128xf32> to vector<8x32xf32>
    %284 = math.tanh %283 : vector<8x32xf32>
    %285 = arith.mulf %281, %267 : vector<8x32xf32>
    %286 = arith.mulf %280, %284 : vector<8x32xf32>
    %287 = arith.addf %285, %286 : vector<8x32xf32>
    %288 = math.tanh %287 : vector<8x32xf32>
    %289 = arith.mulf %282, %288 : vector<8x32xf32>
    %c4_95 = arith.constant 4 : index
    %c0_96 = arith.constant 0 : index
    %c0_97 = arith.constant 0 : index
    %290 = vector.load %arg9[%c4_95, %c0_96, %c0_97] : memref<8x8x128xf32, #tpu.memory_space<vmem>>, vector<1x8x128xf32>
    %291 = vector.shape_cast %290 : vector<1x8x128xf32> to vector<8x128xf32>
    %cst_98 = arith.constant dense<0.000000e+00> : vector<8x128xf32>
    %292 = tpu.matmul %289, %207, %cst_98 {dimension_numbers = #tpu.dot_dimension_numbers<[1], [0], [0], [1], [0, 0, 1, 1], [], []>} : vector<8x32xf32>, vector<32x128xf32>, vector<8x128xf32> -> vector<8x128xf32>
    %293 = arith.addf %291, %292 : vector<8x128xf32>
    %294 = vector.extract_strided_slice %293 {offsets = [0, 0], sizes = [8, 96], strides = [1, 1]} : vector<8x128xf32> to vector<8x96xf32>
    %295 = arith.negf %294 : vector<8x96xf32>
    %296 = math.exp %295 : vector<8x96xf32>
    %cst_99 = arith.constant 1.000000e+00 : f32
    %297 = vector.broadcast %cst_99 : f32 to vector<8x96xf32>
    %298 = arith.addf %297, %296 : vector<8x96xf32>
    %299 = arith.divf %297, %298 : vector<8x96xf32>
    %300 = vector.extract_strided_slice %299 {offsets = [0, 0], sizes = [8, 32], strides = [1, 1]} : vector<8x96xf32> to vector<8x32xf32>
    %301 = vector.extract_strided_slice %299 {offsets = [0, 32], sizes = [8, 32], strides = [1, 1]} : vector<8x96xf32> to vector<8x32xf32>
    %302 = vector.extract_strided_slice %299 {offsets = [0, 64], sizes = [8, 32], strides = [1, 1]} : vector<8x96xf32> to vector<8x32xf32>
    %303 = vector.extract_strided_slice %293 {offsets = [0, 96], sizes = [8, 32], strides = [1, 1]} : vector<8x128xf32> to vector<8x32xf32>
    %304 = math.tanh %303 : vector<8x32xf32>
    %305 = arith.mulf %301, %287 : vector<8x32xf32>
    %306 = arith.mulf %300, %304 : vector<8x32xf32>
    %307 = arith.addf %305, %306 : vector<8x32xf32>
    %308 = math.tanh %307 : vector<8x32xf32>
    %309 = arith.mulf %302, %308 : vector<8x32xf32>
    %c5_100 = arith.constant 5 : index
    %c0_101 = arith.constant 0 : index
    %c0_102 = arith.constant 0 : index
    %310 = vector.load %arg9[%c5_100, %c0_101, %c0_102] : memref<8x8x128xf32, #tpu.memory_space<vmem>>, vector<1x8x128xf32>
    %311 = vector.shape_cast %310 : vector<1x8x128xf32> to vector<8x128xf32>
    %cst_103 = arith.constant dense<0.000000e+00> : vector<8x128xf32>
    %312 = tpu.matmul %309, %207, %cst_103 {dimension_numbers = #tpu.dot_dimension_numbers<[1], [0], [0], [1], [0, 0, 1, 1], [], []>} : vector<8x32xf32>, vector<32x128xf32>, vector<8x128xf32> -> vector<8x128xf32>
    %313 = arith.addf %311, %312 : vector<8x128xf32>
    %314 = vector.extract_strided_slice %313 {offsets = [0, 0], sizes = [8, 96], strides = [1, 1]} : vector<8x128xf32> to vector<8x96xf32>
    %315 = arith.negf %314 : vector<8x96xf32>
    %316 = math.exp %315 : vector<8x96xf32>
    %cst_104 = arith.constant 1.000000e+00 : f32
    %317 = vector.broadcast %cst_104 : f32 to vector<8x96xf32>
    %318 = arith.addf %317, %316 : vector<8x96xf32>
    %319 = arith.divf %317, %318 : vector<8x96xf32>
    %320 = vector.extract_strided_slice %319 {offsets = [0, 0], sizes = [8, 32], strides = [1, 1]} : vector<8x96xf32> to vector<8x32xf32>
    %321 = vector.extract_strided_slice %319 {offsets = [0, 32], sizes = [8, 32], strides = [1, 1]} : vector<8x96xf32> to vector<8x32xf32>
    %322 = vector.extract_strided_slice %319 {offsets = [0, 64], sizes = [8, 32], strides = [1, 1]} : vector<8x96xf32> to vector<8x32xf32>
    %323 = vector.extract_strided_slice %313 {offsets = [0, 96], sizes = [8, 32], strides = [1, 1]} : vector<8x128xf32> to vector<8x32xf32>
    %324 = math.tanh %323 : vector<8x32xf32>
    %325 = arith.mulf %321, %307 : vector<8x32xf32>
    %326 = arith.mulf %320, %324 : vector<8x32xf32>
    %327 = arith.addf %325, %326 : vector<8x32xf32>
    %328 = math.tanh %327 : vector<8x32xf32>
    %329 = arith.mulf %322, %328 : vector<8x32xf32>
    %c6_105 = arith.constant 6 : index
    %c0_106 = arith.constant 0 : index
    %c0_107 = arith.constant 0 : index
    %330 = vector.load %arg9[%c6_105, %c0_106, %c0_107] : memref<8x8x128xf32, #tpu.memory_space<vmem>>, vector<1x8x128xf32>
    %331 = vector.shape_cast %330 : vector<1x8x128xf32> to vector<8x128xf32>
    %cst_108 = arith.constant dense<0.000000e+00> : vector<8x128xf32>
    %332 = tpu.matmul %329, %207, %cst_108 {dimension_numbers = #tpu.dot_dimension_numbers<[1], [0], [0], [1], [0, 0, 1, 1], [], []>} : vector<8x32xf32>, vector<32x128xf32>, vector<8x128xf32> -> vector<8x128xf32>
    %333 = arith.addf %331, %332 : vector<8x128xf32>
    %334 = vector.extract_strided_slice %333 {offsets = [0, 0], sizes = [8, 96], strides = [1, 1]} : vector<8x128xf32> to vector<8x96xf32>
    %335 = arith.negf %334 : vector<8x96xf32>
    %336 = math.exp %335 : vector<8x96xf32>
    %cst_109 = arith.constant 1.000000e+00 : f32
    %337 = vector.broadcast %cst_109 : f32 to vector<8x96xf32>
    %338 = arith.addf %337, %336 : vector<8x96xf32>
    %339 = arith.divf %337, %338 : vector<8x96xf32>
    %340 = vector.extract_strided_slice %339 {offsets = [0, 0], sizes = [8, 32], strides = [1, 1]} : vector<8x96xf32> to vector<8x32xf32>
    %341 = vector.extract_strided_slice %339 {offsets = [0, 32], sizes = [8, 32], strides = [1, 1]} : vector<8x96xf32> to vector<8x32xf32>
    %342 = vector.extract_strided_slice %339 {offsets = [0, 64], sizes = [8, 32], strides = [1, 1]} : vector<8x96xf32> to vector<8x32xf32>
    %343 = vector.extract_strided_slice %333 {offsets = [0, 96], sizes = [8, 32], strides = [1, 1]} : vector<8x128xf32> to vector<8x32xf32>
    %344 = math.tanh %343 : vector<8x32xf32>
    %345 = arith.mulf %341, %327 : vector<8x32xf32>
    %346 = arith.mulf %340, %344 : vector<8x32xf32>
    %347 = arith.addf %345, %346 : vector<8x32xf32>
    %348 = math.tanh %347 : vector<8x32xf32>
    %349 = arith.mulf %342, %348 : vector<8x32xf32>
    %c7_110 = arith.constant 7 : index
    %c0_111 = arith.constant 0 : index
    %c0_112 = arith.constant 0 : index
    %350 = vector.load %arg9[%c7_110, %c0_111, %c0_112] : memref<8x8x128xf32, #tpu.memory_space<vmem>>, vector<1x8x128xf32>
    %351 = vector.shape_cast %350 : vector<1x8x128xf32> to vector<8x128xf32>
    %cst_113 = arith.constant dense<0.000000e+00> : vector<8x128xf32>
    %352 = tpu.matmul %349, %207, %cst_113 {dimension_numbers = #tpu.dot_dimension_numbers<[1], [0], [0], [1], [0, 0, 1, 1], [], []>} : vector<8x32xf32>, vector<32x128xf32>, vector<8x128xf32> -> vector<8x128xf32>
    %353 = arith.addf %351, %352 : vector<8x128xf32>
    %354 = vector.extract_strided_slice %353 {offsets = [0, 0], sizes = [8, 96], strides = [1, 1]} : vector<8x128xf32> to vector<8x96xf32>
    %355 = arith.negf %354 : vector<8x96xf32>
    %356 = math.exp %355 : vector<8x96xf32>
    %cst_114 = arith.constant 1.000000e+00 : f32
    %357 = vector.broadcast %cst_114 : f32 to vector<8x96xf32>
    %358 = arith.addf %357, %356 : vector<8x96xf32>
    %359 = arith.divf %357, %358 : vector<8x96xf32>
    %360 = vector.extract_strided_slice %359 {offsets = [0, 0], sizes = [8, 32], strides = [1, 1]} : vector<8x96xf32> to vector<8x32xf32>
    %361 = vector.extract_strided_slice %359 {offsets = [0, 32], sizes = [8, 32], strides = [1, 1]} : vector<8x96xf32> to vector<8x32xf32>
    %362 = vector.extract_strided_slice %359 {offsets = [0, 64], sizes = [8, 32], strides = [1, 1]} : vector<8x96xf32> to vector<8x32xf32>
    %363 = vector.extract_strided_slice %353 {offsets = [0, 96], sizes = [8, 32], strides = [1, 1]} : vector<8x128xf32> to vector<8x32xf32>
    %364 = math.tanh %363 : vector<8x32xf32>
    %365 = arith.mulf %361, %347 : vector<8x32xf32>
    %366 = arith.mulf %360, %364 : vector<8x32xf32>
    %367 = arith.addf %365, %366 : vector<8x32xf32>
    %368 = math.tanh %367 : vector<8x32xf32>
    %369 = arith.mulf %362, %368 : vector<8x32xf32>
    %cst_115 = arith.constant dense<0.000000e+00> : vector<8xf32>
    %370 = vector.multi_reduction <add>, %369, %cst_115 [1] : vector<8x32xf32> to vector<8xf32>
    %371 = vector.shape_cast %370 : vector<8xf32> to vector<8x1xf32>
    %cst_116 = arith.constant 3.200000e+01 : f32
    %372 = vector.broadcast %cst_116 : f32 to vector<8x1xf32>
    %373 = arith.divf %371, %372 : vector<8x1xf32>
    %374 = vector.broadcast %373 : vector<8x1xf32> to vector<8x32xf32>
    %375 = arith.subf %369, %374 : vector<8x32xf32>
    %376 = arith.mulf %375, %375 : vector<8x32xf32>
    %cst_117 = arith.constant dense<0.000000e+00> : vector<8xf32>
    %377 = vector.multi_reduction <add>, %376, %cst_117 [1] : vector<8x32xf32> to vector<8xf32>
    %378 = vector.shape_cast %377 : vector<8xf32> to vector<8x1xf32>
    %cst_118 = arith.constant 3.200000e+01 : f32
    %379 = vector.broadcast %cst_118 : f32 to vector<8x1xf32>
    %380 = arith.divf %378, %379 : vector<8x1xf32>
    %cst_119 = arith.constant 9.99999974E-6 : f32
    %381 = vector.broadcast %cst_119 : f32 to vector<8x1xf32>
    %382 = arith.addf %380, %381 : vector<8x1xf32>
    %383 = math.rsqrt %382 : vector<8x1xf32>
    %384 = vector.broadcast %373 : vector<8x1xf32> to vector<8x32xf32>
    %385 = arith.subf %369, %384 : vector<8x32xf32>
    %386 = vector.broadcast %383 : vector<8x1xf32> to vector<8x32xf32>
    %387 = arith.mulf %385, %386 : vector<8x32xf32>
    %c0_120 = arith.constant 0 : index
    %c0_121 = arith.constant 0 : index
    %388 = vector.load %arg6[%c0_120, %c0_121] : memref<1x32xf32, #tpu.memory_space<vmem>>, vector<1x32xf32>
    %389 = vector.broadcast %388 : vector<1x32xf32> to vector<8x32xf32>
    %390 = arith.mulf %387, %389 : vector<8x32xf32>
    %c0_122 = arith.constant 0 : index
    %c0_123 = arith.constant 0 : index
    %391 = vector.load %arg7[%c0_122, %c0_123] : memref<1x32xf32, #tpu.memory_space<vmem>>, vector<1x32xf32>
    %392 = vector.broadcast %391 : vector<1x32xf32> to vector<8x32xf32>
    %393 = arith.addf %390, %392 : vector<8x32xf32>
    %c0_124 = arith.constant 0 : index
    %c0_125 = arith.constant 0 : index
    %394 = vector.load %arg8[%c0_124, %c0_125] : memref<8x32xf32, #tpu.memory_space<vmem>>, vector<8x32xf32>
    tpu.vector_store %arg8[%c0_124, %c0_125], %393 {strides = array<i32>} : memref<8x32xf32, #tpu.memory_space<vmem>>, vector<8x32xf32>,
    return
  }
  func.func @transform_0(%arg0: i32) -> (i32, i32, i32) {
    %c0_i32 = arith.constant 0 : i32
    %c0_i32_0 = arith.constant 0 : i32
    %c0_i32_1 = arith.constant 0 : i32
    return %c0_i32, %arg0, %c0_i32_0 : i32, i32, i32
  }
  func.func @transform_1(%arg0: i32) -> (i32, i32) {
    %c0_i32 = arith.constant 0 : i32
    %c0_i32_0 = arith.constant 0 : i32
    %c0_i32_1 = arith.constant 0 : i32
    return %c0_i32, %c0_i32_0 : i32, i32
  }
  func.func @transform_2(%arg0: i32) -> (i32, i32) {
    %c0_i32 = arith.constant 0 : i32
    %c0_i32_0 = arith.constant 0 : i32
    %c0_i32_1 = arith.constant 0 : i32
    return %c0_i32, %c0_i32_0 : i32, i32
  }
  func.func @transform_3(%arg0: i32) -> (i32, i32) {
    %c0_i32 = arith.constant 0 : i32
    %c0_i32_0 = arith.constant 0 : i32
    %c0_i32_1 = arith.constant 0 : i32
    return %c0_i32, %c0_i32_0 : i32, i32
  }
  func.func @transform_4(%arg0: i32) -> (i32, i32) {
    %c0_i32 = arith.constant 0 : i32
    %c0_i32_0 = arith.constant 0 : i32
    %c0_i32_1 = arith.constant 0 : i32
    return %c0_i32, %c0_i32_0 : i32, i32
  }
  func.func @transform_5(%arg0: i32) -> (i32, i32) {
    %c0_i32 = arith.constant 0 : i32
    %c0_i32_0 = arith.constant 0 : i32
    %c0_i32_1 = arith.constant 0 : i32
    return %c0_i32, %c0_i32_0 : i32, i32
  }
  func.func @transform_6(%arg0: i32) -> (i32, i32) {
    %c0_i32 = arith.constant 0 : i32
    %c0_i32_0 = arith.constant 0 : i32
    %c0_i32_1 = arith.constant 0 : i32
    return %c0_i32, %c0_i32_0 : i32, i32
  }
  func.func @transform_7(%arg0: i32) -> (i32, i32) {
    %c0_i32 = arith.constant 0 : i32
    %c0_i32_0 = arith.constant 0 : i32
    return %arg0, %c0_i32 : i32, i32
  }
}

</mosaic_0001>

<bundles_post_ra>
// kernel: lstm_model_forward.1
= control target key start
LH: loop header
LB: loop body
LE: loop exit
PB: predicated region body
PF: predicated region fallthrough
CT: control target
= control target key end

     0   :  { %v1491_v4 = vmov 0.0   ;;  %s1492_s10 = smov 32   ;;  %vm39_vm4 = vcmask 261120   ;;  %s1863_s2 = inlined_call_operand.vmem [shape: f32[32,128], index: 2, kind: input, shape index: {}]   ;;  %s1864_s0 = inlined_call_operand.vmem [shape: f32[8,8,128], index: 0, kind: input, shape index: {}]   ;;  %s1865_s1 = inlined_call_operand.vmem [shape: f32[32,128], index: 1, kind: input, shape index: {}]   ;;  %s1866_s4 = inlined_call_operand.vmem [shape: f32[1,128], index: 4, kind: input, shape index: {}]   ;;  %s1867_s3 = inlined_call_operand.vmem [shape: f32[32,128], index: 3, kind: input, shape index: {}]   ;;  %s1868_s5 = inlined_call_operand.vmem [shape: f32[1,32], index: 5, kind: input, shape index: {}]   ;;  %s1869_s6 = inlined_call_operand.vmem [shape: f32[1,32], index: 6, kind: input, shape index: {}]   ;;  %s1870_s7 = inlined_call_operand.vmem [shape: f32[8,32], index: 7, kind: output, shape index: {}]  }
   0x1   :  { %v1538_v0 = vld [vmem:[%s1863_s2 + $0x18] sm:$0xff]  ;;  %v1543_v1 = vld [vmem:[%s1863_s2 + $0x10] sm:$0xff]  ;;  %v1550_v2 = vld [vmem:[%s1863_s2 + $0x8] sm:$0xff] }
   0x2   :  { %55 = vmatpush.msra.mxu0 %v1538_v0  ;;  %141 = vmatpush.msra.mxu2 %v1538_v0  ;;  %v1557_v3 = vld [vmem:[%s1863_s2] sm:$0xff]  ;;  %v1588_v28 = vld [vmem:[%s1865_s1 + $0x18] sm:$0xff]  ;;  %v1593_v29 = vld [vmem:[%s1865_s1 + $0x10] sm:$0xff] }
   0x3   :  { %v38_v5 = vld [vmem:[%s1864_s0] sm:$0xff]  ;;  %118 = vmatpush.msra.mxu1 %v1588_v28  ;;  %204 = vmatpush.msra.mxu3 %v1588_v28  ;;  %v1600_v30 = vld [vmem:[%s1865_s1 + $0x8] sm:$0xff]  ;;  %v1313_v61 = vld [vmem:[%s1864_s0 + $0x10] sm:$0xff] }
   0x4   :  { %56 = vmatpush.msra.mxu0 %v1543_v1  ;;  %142 = vmatpush.msra.mxu2 %v1543_v1  ;;  %v1607_v31 = vld [vmem:[%s1865_s1] sm:$0xff]  ;;  %s1493_s1 = smov 64   ;;  %v1309_v35 = vld [vmem:[%s1864_s0 + $0x8] sm:$0xff] }
   0x5   :  { %119 = vmatpush.msra.mxu1 %v1593_v29  ;;  %205 = vmatpush.msra.mxu3 %v1593_v29 }
   0x6   :  { %57 = vmatpush.msra.mxu0 %v1550_v2  ;;  %143 = vmatpush.msra.mxu2 %v1550_v2 }
   0x7   :  { %120 = vmatpush.msra.mxu1 %v1600_v30  ;;  %206 = vmatpush.msra.mxu3 %v1600_v30 }
   0x8   :  { %58 = vmatpush.msra.mxu0 %v1557_v3  ;;  %144 = vmatpush.msra.mxu2 %v1557_v3 }
   0x9   :  { %59 = vmatmul.f32.vlgmr.msra.gmra.mxu0 %v1491_v4  ;;  %121 = vmatpush.msra.mxu1 %v1607_v31 }
   0xa   :  { %315 = vmatpush.msrb.mxu2 %v1538_v0  ;;  %228 = vmatpush.msrb.mxu0 %v1538_v0 }
   0xb   :  { %207 = vmatpush.msra.mxu3 %v1607_v31  ;;  %291 = vmatpush.msrb.mxu1 %v1588_v28 }
   0xc   :  { %316 = vmatpush.msrb.mxu2 %v1543_v1  ;;  %229 = vmatpush.msrb.mxu0 %v1543_v1 }
   0xd   :  { %378 = vmatpush.msrb.mxu3 %v1588_v28  ;;  %292 = vmatpush.msrb.mxu1 %v1593_v29 }
   0xe   :  { %317 = vmatpush.msrb.mxu2 %v1550_v2  ;;  %230 = vmatpush.msrb.mxu0 %v1550_v2 }
   0xf   :  { %379 = vmatpush.msrb.mxu3 %v1593_v29  ;;  %293 = vmatpush.msrb.mxu1 %v1600_v30 }
  0x10   :  { %318 = vmatpush.msrb.mxu2 %v1557_v3  ;;  %231 = vmatpush.msrb.mxu0 %v1557_v3 }
  0x11   :  { %380 = vmatpush.msrb.mxu3 %v1600_v30  ;;  %294 = vmatpush.msrb.mxu1 %v1607_v31 }
  0x12   :  { %402 = vmatpush.msra.mxu0 %v1538_v0 }
  0x13   :  { %381 = vmatpush.msrb.mxu3 %v1607_v31 }
  0x14   :  { %403 = vmatpush.msra.mxu0 %v1543_v1 }
  0x16   :  { %404 = vmatpush.msra.mxu0 %v1550_v2 }
  0x18   :  { %405 = vmatpush.msra.mxu0 %v1557_v3 }
  0x86   :  { %v60_v6 = vpop.f32.mrf.mxu0 }
  0x87   :  { %v63_v7 = vadd.f32 %v60_v6, %v38_v5 }
  0x89   :  { %1359 = vtanh.f32 %v63_v7  ;;  %v1307_v9 = vmul.f32 -1.442695, %v63_v7 }
  0x8b   :  { %1361 = vpow2.f32 %v1307_v9 }
  0x8f   :  { %v1360_v8 = vpop.eup %1359 }
  0x90   :  { %86 = vrot.lane.b32.xlu0 %v1360_v8, %s1492_s10 }
  0x91   :  { %v1362_v10 = vpop.eup %1361 }
  0x92   :  { %v67_v11 = vadd.f32 1.0, %v1362_v10 }
  0x94   :  { %1363 = vrcp.f32 %v67_v11  ;;  %v79_v17 = vand.u32 2147483648, %v67_v11  ;;  %vm73_vm1 = vweird.f32 %v67_v11  ;;  %v77_v18 = vand.u32 2147483647, %v67_v11 }
  0x96   :  { %v80_v20 = vor.u32 1.1754944e-38, %v79_v17  ;;  %vm78_vm3 = vcmp.eq.f32.partialorder %v77_v18, 8.507059e+37 }
  0x9a   :  { %v1364_v12 = vpop.eup %1363 }
  0x9b   :  { %v69_v13 = vmul.f32 %v1364_v12, %v67_v11  ;;  %vm74_vm0 = vweird.f32 %v1364_v12 }
  0x9c   :  { %vm75_vm2 = vmor %vm73_vm1, %vm74_vm0 }
  0x9d   :  { %v70_v14 = vsub.f32 1.0, %v69_v13 }
  0x9f   :  { %v71_v15 = vmul.f32 %v1364_v12, %v70_v14 }
  0xa1   :  { %v72_v16 = vadd.f32 %v1364_v12, %v71_v15 }
  0xa3   :  { %v76_v19 = vsel %vm75_vm2, %v1364_v12, %v72_v16 }
  0xa4   :  { %v81_v22 = vsel %vm78_vm3, %v80_v20, %v76_v19 }
  0xa5   :  { %v84_v24 = vmul.f32 0.0, %v81_v22 }
 0x102   :  { %v87_v21 = vpop.permute.xlu0 %86 }
 0x103   :  { %v89_v23 = vmul.f32 %v87_v21, %v81_v22 }
 0x105   :  { %91 = vrot.lane.b32.xlu0 %v89_v23, %s1492_s10 }
 0x177   :  { %v92_v25 = vpop.permute.xlu0 %91 }
 0x178   :  { %v1581_v26 = vadd.f32 %v92_v25, %v84_v24 }
 0x17a   :  { %1365 = vtanh.f32 %v1581_v26 }
 0x180   :  { %v1366_v27 = vpop.eup %1365 }
 0x181   :  { %97 = vrot.lane.b32.xlu1 %v1366_v27, %s1492_s10 }
 0x1f3   :  { %v98_v32 = vpop.permute.xlu1 %97 }
 0x1f4   :  { %v100_v33 = vmul.f32 %v98_v32, %v81_v22  ;;  %v1317_v32 = vld [vmem:[%s1864_s0 + $0x18] sm:$0xff] }
 0x1f6   :  { %102 = vrot.lane.b32.xlu1 %v100_v33, %s1493_s1 }
 0x268   :  { %v103_v34 = vpop.permute.xlu1 %102 }
 0x269   :  { %1308 = vmatmul.msk.f32.vlgmr.msra.gmra.mxu1 %vm39_vm4, %v103_v34  ;;  %1310 = vmatmul.msk.f32.vlgmr.msra.gmra.mxu2 %vm39_vm4, %v103_v34 }
 0x26a   :  { %489 = vmatpush.msra.mxu2 %v1538_v0  ;;  %465 = vmatpush.msra.mxu1 %v1588_v28 }
 0x26c   :  { %490 = vmatpush.msra.mxu2 %v1543_v1  ;;  %466 = vmatpush.msra.mxu1 %v1593_v29 }
 0x26e   :  { %491 = vmatpush.msra.mxu2 %v1550_v2  ;;  %467 = vmatpush.msra.mxu1 %v1600_v30 }
 0x270   :  { %492 = vmatpush.msra.mxu2 %v1557_v3  ;;  %468 = vmatpush.msra.mxu1 %v1607_v31 }
 0x2ec   :  { %v146_v36 = vpop.f32.mrf.mxu2 }
 0x2ed   :  { %v149_v37 = vadd.f32 %v1309_v35, %v146_v36 }
 0x2ef   :  { %1367 = vtanh.f32 %v149_v37  ;;  %v1311_v39 = vmul.f32 -1.442695, %v149_v37 }
 0x2f1   :  { %1369 = vpow2.f32 %v1311_v39 }
 0x2f5   :  { %v1368_v38 = vpop.eup %1367 }
 0x2f6   :  { %172 = vrot.lane.b32.xlu2 %v1368_v38, %s1492_s10 }
 0x2f7   :  { %v1370_v40 = vpop.eup %1369 }
 0x2f8   :  { %v153_v41 = vadd.f32 1.0, %v1370_v40 }
 0x2fa   :  { %1371 = vrcp.f32 %v153_v41  ;;  %v165_v47 = vand.u32 2147483648, %v153_v41  ;;  %vm159_vm6 = vweird.f32 %v153_v41  ;;  %v163_v48 = vand.u32 2147483647, %v153_v41 }
 0x2fc   :  { %v166_v50 = vor.u32 1.1754944e-38, %v165_v47  ;;  %vm164_vm8 = vcmp.eq.f32.partialorder %v163_v48, 8.507059e+37 }
 0x300   :  { %v1372_v42 = vpop.eup %1371 }
 0x301   :  { %v155_v43 = vmul.f32 %v1372_v42, %v153_v41  ;;  %vm160_vm5 = vweird.f32 %v1372_v42 }
 0x302   :  { %vm161_vm7 = vmor %vm159_vm6, %vm160_vm5 }
 0x303   :  { %v156_v44 = vsub.f32 1.0, %v155_v43 }
 0x305   :  { %v157_v45 = vmul.f32 %v1372_v42, %v156_v44 }
 0x307   :  { %v158_v46 = vadd.f32 %v1372_v42, %v157_v45 }
 0x309   :  { %v162_v49 = vsel %vm161_vm7, %v1372_v42, %v158_v46 }
 0x30a   :  { %v167_v52 = vsel %vm164_vm8, %v166_v50, %v162_v49 }
 0x30b   :  { %v170_v54 = vmul.f32 %v167_v52, %v1581_v26 }
 0x350   :  { %v173_v51 = vpop.permute.xlu2 %172 }
 0x351   :  { %v175_v53 = vmul.f32 %v173_v51, %v167_v52 }
 0x353   :  { %177 = vrot.lane.b32.xlu2 %v175_v53, %s1492_s10 }
 0x3ad   :  { %v178_v55 = vpop.permute.xlu2 %177 }
 0x3ae   :  { %v180_v56 = vadd.f32 %v178_v55, %v170_v54  ;;  %v1321_v54 = vld [vmem:[%s1864_s0 + $0x20] sm:$0xff] }
 0x3b0   :  { %1373 = vtanh.f32 %v180_v56 }
 0x3b6   :  { %v1374_v57 = vpop.eup %1373 }
 0x3b7   :  { %183 = vrot.lane.b32.xlu0 %v1374_v57, %s1492_s10 }
 0x429   :  { %v184_v58 = vpop.permute.xlu0 %183 }
 0x42a   :  { %v186_v59 = vmul.f32 %v184_v58, %v167_v52 }
 0x42c   :  { %188 = vrot.lane.b32.xlu1 %v186_v59, %s1493_s1 }
 0x49e   :  { %v189_v60 = vpop.permute.xlu1 %188 }
 0x49f   :  { %1312 = vmatmul.msk.f32.vlgmr.msra.gmra.mxu3 %vm39_vm4, %v189_v60  ;;  %1314 = vmatmul.msk.f32.vlgmr.msrb.gmra.mxu0 %vm39_vm4, %v189_v60 }
 0x4a0   :  { %576 = vmatpush.msrb.mxu0 %v1538_v0  ;;  %552 = vmatpush.msra.mxu3 %v1588_v28 }
 0x4a2   :  { %577 = vmatpush.msrb.mxu0 %v1543_v1  ;;  %553 = vmatpush.msra.mxu3 %v1593_v29 }
 0x4a4   :  { %578 = vmatpush.msrb.mxu0 %v1550_v2  ;;  %554 = vmatpush.msra.mxu3 %v1600_v30 }
 0x4a6   :  { %579 = vmatpush.msrb.mxu0 %v1557_v3  ;;  %555 = vmatpush.msra.mxu3 %v1607_v31 }
 0x51c   :  { %v233_v62 = vpop.f32.mrf.mxu0 }
 0x51d   :  { %v236_v63 = vadd.f32 %v1313_v61, %v233_v62 }
 0x51f   :  { %1375 = vtanh.f32 %v236_v63  ;;  %v1315_v6 = vmul.f32 -1.442695, %v236_v63 }
 0x521   :  { %1377 = vpow2.f32 %v1315_v6 }
 0x525   :  { %v1376_v5 = vpop.eup %1375 }
 0x526   :  { %259 = vrot.lane.b32.xlu2 %v1376_v5, %s1492_s10 }
 0x527   :  { %v1378_v7 = vpop.eup %1377 }
 0x528   :  { %v240_v8 = vadd.f32 1.0, %v1378_v7 }
 0x52a   :  { %1379 = vrcp.f32 %v240_v8  ;;  %v252_v14 = vand.u32 2147483648, %v240_v8  ;;  %vm246_vm10 = vweird.f32 %v240_v8  ;;  %v250_v15 = vand.u32 2147483647, %v240_v8 }
 0x52c   :  { %v253_v17 = vor.u32 1.1754944e-38, %v252_v14  ;;  %vm251_vm12 = vcmp.eq.f32.partialorder %v250_v15, 8.507059e+37 }
 0x530   :  { %v1380_v9 = vpop.eup %1379 }
 0x531   :  { %v242_v10 = vmul.f32 %v1380_v9, %v240_v8  ;;  %vm247_vm9 = vweird.f32 %v1380_v9 }
 0x532   :  { %vm248_vm11 = vmor %vm246_vm10, %vm247_vm9 }
 0x533   :  { %v243_v11 = vsub.f32 1.0, %v242_v10 }
 0x535   :  { %v244_v12 = vmul.f32 %v1380_v9, %v243_v11 }
 0x537   :  { %v245_v13 = vadd.f32 %v1380_v9, %v244_v12 }
 0x539   :  { %v249_v16 = vsel %vm248_vm11, %v1380_v9, %v245_v13 }
 0x53a   :  { %v254_v19 = vsel %vm251_vm12, %v253_v17, %v249_v16  ;;  %v1325_v17 = vld [vmem:[%s1864_s0 + $0x28] sm:$0xff] }
 0x53b   :  { %v257_v21 = vmul.f32 %v254_v19, %v180_v56 }
 0x580   :  { %v260_v18 = vpop.permute.xlu2 %259 }
 0x581   :  { %v262_v20 = vmul.f32 %v260_v18, %v254_v19 }
 0x583   :  { %264 = vrot.lane.b32.xlu0 %v262_v20, %s1492_s10 }
 0x5f5   :  { %v265_v22 = vpop.permute.xlu0 %264 }
 0x5f6   :  { %v267_v23 = vadd.f32 %v265_v22, %v257_v21 }
 0x5f8   :  { %1381 = vtanh.f32 %v267_v23 }
 0x5fe   :  { %v1382_v24 = vpop.eup %1381 }
 0x5ff   :  { %270 = vrot.lane.b32.xlu1 %v1382_v24, %s1492_s10 }
 0x671   :  { %v271_v25 = vpop.permute.xlu1 %270 }
 0x672   :  { %v273_v26 = vmul.f32 %v271_v25, %v254_v19 }
 0x674   :  { %275 = vrot.lane.b32.xlu2 %v273_v26, %s1493_s1 }
 0x6ce   :  { %v276_v27 = vpop.permute.xlu2 %275 }
 0x6cf   :  { %1316 = vmatmul.msk.f32.vlgmr.msrb.gmra.mxu1 %vm39_vm4, %v276_v27  ;;  %1318 = vmatmul.msk.f32.vlgmr.msrb.gmra.mxu2 %vm39_vm4, %v276_v27 }
 0x6d0   :  { %639 = vmatpush.msrb.mxu1 %v1588_v28  ;;  %663 = vmatpush.msrb.mxu2 %v1538_v0 }
 0x6d2   :  { %640 = vmatpush.msrb.mxu1 %v1593_v29  ;;  %664 = vmatpush.msrb.mxu2 %v1543_v1 }
 0x6d4   :  { %641 = vmatpush.msrb.mxu1 %v1600_v30  ;;  %665 = vmatpush.msrb.mxu2 %v1550_v2 }
 0x6d6   :  { %642 = vmatpush.msrb.mxu1 %v1607_v31  ;;  %666 = vmatpush.msrb.mxu2 %v1557_v3 }
 0x752   :  { %v320_v33 = vpop.f32.mrf.mxu2 }
 0x753   :  { %v323_v34 = vadd.f32 %v1317_v32, %v320_v33 }
 0x755   :  { %1383 = vtanh.f32 %v323_v34  ;;  %v1319_v35 = vmul.f32 -1.442695, %v323_v34 }
 0x757   :  { %1385 = vpow2.f32 %v1319_v35 }
 0x75b   :  { %v1384_v0 = vpop.eup %1383 }
 0x75c   :  { %346 = vrot.lane.b32.xlu0 %v1384_v0, %s1492_s10 }
 0x75d   :  { %v1386_v1 = vpop.eup %1385 }
 0x75e   :  { %v327_v36 = vadd.f32 1.0, %v1386_v1 }
 0x760   :  { %1387 = vrcp.f32 %v327_v36  ;;  %v339_v40 = vand.u32 2147483648, %v327_v36  ;;  %vm333_vm14 = vweird.f32 %v327_v36  ;;  %v337_v41 = vand.u32 2147483647, %v327_v36 }
 0x762   :  { %v340_v43 = vor.u32 1.1754944e-38, %v339_v40  ;;  %vm338_vm0 = vcmp.eq.f32.partialorder %v337_v41, 8.507059e+37 }
 0x766   :  { %v1388_v2 = vpop.eup %1387 }
 0x767   :  { %v329_v37 = vmul.f32 %v1388_v2, %v327_v36  ;;  %vm334_vm13 = vweird.f32 %v1388_v2 }
 0x768   :  { %vm335_vm15 = vmor %vm333_vm14, %vm334_vm13 }
 0x769   :  { %v330_v38 = vsub.f32 1.0, %v329_v37 }
 0x76b   :  { %v331_v39 = vmul.f32 %v1388_v2, %v330_v38 }
 0x76d   :  { %v332_v3 = vadd.f32 %v1388_v2, %v331_v39 }
 0x76f   :  { %v336_v42 = vsel %vm335_vm15, %v1388_v2, %v332_v3 }
 0x770   :  { %v341_v45 = vsel %vm338_vm0, %v340_v43, %v336_v42  ;;  %v1702_v42 = vld [vmem:[%s1867_s3 + $0x18] sm:$0xff]  ;;  %v1707_v43 = vld [vmem:[%s1867_s3 + $0x10] sm:$0xff] }
 0x771   :  { %v344_v47 = vmul.f32 %v341_v45, %v267_v23 }
 0x7ce   :  { %v347_v44 = vpop.permute.xlu0 %346 }
 0x7cf   :  { %v349_v46 = vmul.f32 %v347_v44, %v341_v45  ;;  %v1714_v44 = vld [vmem:[%s1867_s3 + $0x8] sm:$0xff] }
 0x7d1   :  { %351 = vrot.lane.b32.xlu1 %v349_v46, %s1492_s10 }
 0x843   :  { %v352_v48 = vpop.permute.xlu1 %351 }
 0x844   :  { %v354_v49 = vadd.f32 %v352_v48, %v344_v47  ;;  %v1329_v47 = vld [vmem:[%s1864_s0 + $0x30] sm:$0xff] }
 0x846   :  { %1389 = vtanh.f32 %v354_v49 }
 0x84c   :  { %v1390_v50 = vpop.eup %1389 }
 0x84d   :  { %357 = vrot.lane.b32.xlu2 %v1390_v50, %s1492_s10  ;;  %v1748_v50 = vld [vmem:[%s1866_s4] ss:$0 sm:$0xff] }
 0x8a7   :  { %v358_v51 = vpop.permute.xlu2 %357 }
 0x8a8   :  { %v360_v52 = vmul.f32 %v358_v51, %v341_v45  ;;  %v1722_v45 = vld [vmem:[%s1867_s3] sm:$0xff]  ;;  %v123_v51 = vpop.f32.mrf.mxu1 }
 0x8aa   :  { %362 = vrot.lane.b32.xlu0 %v360_v52, %s1493_s1  ;;  %v124_v52 = vadd.f32 %v1748_v50, %v123_v51 }
 0x91c   :  { %v363_v53 = vpop.permute.xlu0 %362 }
 0x91d   :  { %1320 = vmatmul.msk.f32.vlgmr.msrb.gmra.mxu3 %vm39_vm4, %v363_v53  ;;  %1322 = vmatmul.msk.f32.vlgmr.msra.gmra.mxu0 %vm39_vm4, %v363_v53 }
 0x91e   :  { %726 = vmatpush.msrb.mxu3 %v1588_v28  ;;  %753 = vmatpush.msra.mxu0 %v1702_v42 }
 0x920   :  { %727 = vmatpush.msrb.mxu3 %v1593_v29  ;;  %754 = vmatpush.msra.mxu0 %v1707_v43 }
 0x922   :  { %728 = vmatpush.msrb.mxu3 %v1600_v30  ;;  %755 = vmatpush.msra.mxu0 %v1714_v44 }
 0x924   :  { %729 = vmatpush.msrb.mxu3 %v1607_v31  ;;  %756 = vmatpush.msra.mxu0 %v1722_v45 }
 0x99a   :  { %v407_v55 = vpop.f32.mrf.mxu0 }
 0x99b   :  { %v410_v56 = vadd.f32 %v1321_v54, %v407_v55 }
 0x99d   :  { %1391 = vtanh.f32 %v410_v56  ;;  %v1323_v58 = vmul.f32 -1.442695, %v410_v56 }
 0x99f   :  { %1393 = vpow2.f32 %v1323_v58 }
 0x9a3   :  { %v1392_v57 = vpop.eup %1391 }
 0x9a4   :  { %433 = vrot.lane.b32.xlu1 %v1392_v57, %s1492_s10 }
 0x9a5   :  { %v1394_v59 = vpop.eup %1393 }
 0x9a6   :  { %v414_v28 = vadd.f32 1.0, %v1394_v59 }
 0x9a8   :  { %1395 = vrcp.f32 %v414_v28  ;;  %v426_v62 = vand.u32 2147483648, %v414_v28  ;;  %vm420_vm2 = vweird.f32 %v414_v28  ;;  %v424_v63 = vand.u32 2147483647, %v414_v28 }
 0x9aa   :  { %v427_v6 = vor.u32 1.1754944e-38, %v426_v62  ;;  %vm425_vm5 = vcmp.eq.f32.partialorder %v424_v63, 8.507059e+37 }
 0x9ae   :  { %v1396_v29 = vpop.eup %1395 }
 0x9af   :  { %v416_v60 = vmul.f32 %v1396_v29, %v414_v28  ;;  %vm421_vm1 = vweird.f32 %v1396_v29 }
 0x9b0   :  { %vm422_vm3 = vmor %vm420_vm2, %vm421_vm1 }
 0x9b1   :  { %v417_v30 = vsub.f32 1.0, %v416_v60 }
 0x9b3   :  { %v418_v61 = vmul.f32 %v1396_v29, %v417_v30 }
 0x9b5   :  { %v419_v31 = vadd.f32 %v1396_v29, %v418_v61 }
 0x9b7   :  { %v423_v5 = vsel %vm422_vm3, %v1396_v29, %v419_v31 }
 0x9b8   :  { %v428_v8 = vsel %vm425_vm5, %v427_v6, %v423_v5 }
 0x9b9   :  { %v431_v10 = vmul.f32 %v428_v8, %v354_v49 }
 0xa16   :  { %v434_v7 = vpop.permute.xlu1 %433 }
 0xa17   :  { %v436_v9 = vmul.f32 %v434_v7, %v428_v8 }
 0xa19   :  { %438 = vrot.lane.b32.xlu2 %v436_v9, %s1492_s10 }
 0xa73   :  { %v439_v11 = vpop.permute.xlu2 %438 }
 0xa74   :  { %v441_v12 = vadd.f32 %v439_v11, %v431_v10 }
 0xa76   :  { %1397 = vtanh.f32 %v441_v12 }
 0xa7c   :  { %v1398_v13 = vpop.eup %1397 }
 0xa7d   :  { %444 = vrot.lane.b32.xlu0 %v1398_v13, %s1492_s10 }
 0xaef   :  { %v445_v14 = vpop.permute.xlu0 %444 }
 0xaf0   :  { %v447_v15 = vmul.f32 %v445_v14, %v428_v8 }
 0xaf2   :  { %449 = vrot.lane.b32.xlu1 %v447_v15, %s1493_s1 }
 0xb64   :  { %v450_v16 = vpop.permute.xlu1 %449 }
 0xb65   :  { %1324 = vmatmul.msk.f32.vlgmr.msra.gmra.mxu1 %vm39_vm4, %v450_v16  ;;  %1326 = vmatmul.msk.f32.vlgmr.msra.gmra.mxu2 %vm39_vm4, %v450_v16 }
 0xb66   :  { %817 = vmatpush.msra.mxu1 %v1702_v42  ;;  %881 = vmatpush.msra.mxu2 %v1702_v42 }
 0xb68   :  { %818 = vmatpush.msra.mxu1 %v1707_v43  ;;  %882 = vmatpush.msra.mxu2 %v1707_v43 }
 0xb6a   :  { %819 = vmatpush.msra.mxu1 %v1714_v44  ;;  %883 = vmatpush.msra.mxu2 %v1714_v44 }
 0xb6c   :  { %820 = vmatpush.msra.mxu1 %v1722_v45  ;;  %884 = vmatpush.msra.mxu2 %v1722_v45 }
 0xbe8   :  { %v494_v18 = vpop.f32.mrf.mxu2 }
 0xbe9   :  { %v497_v19 = vadd.f32 %v1325_v17, %v494_v18 }
 0xbeb   :  { %1399 = vtanh.f32 %v497_v19  ;;  %v1327_v21 = vmul.f32 -1.442695, %v497_v19 }
 0xbed   :  { %1401 = vpow2.f32 %v1327_v21 }
 0xbf1   :  { %v1400_v20 = vpop.eup %1399 }
 0xbf2   :  { %520 = vrot.lane.b32.xlu2 %v1400_v20, %s1492_s10 }
 0xbf3   :  { %v1402_v22 = vpop.eup %1401 }
 0xbf4   :  { %v501_v23 = vadd.f32 1.0, %v1402_v22 }
 0xbf6   :  { %1403 = vrcp.f32 %v501_v23  ;;  %v513_v33 = vand.u32 2147483648, %v501_v23  ;;  %vm507_vm7 = vweird.f32 %v501_v23  ;;  %v511_v34 = vand.u32 2147483647, %v501_v23 }
 0xbf8   :  { %v514_v35 = vor.u32 1.1754944e-38, %v513_v33  ;;  %vm512_vm9 = vcmp.eq.f32.partialorder %v511_v34, 8.507059e+37 }
 0xbfc   :  { %v1404_v24 = vpop.eup %1403 }
 0xbfd   :  { %v503_v25 = vmul.f32 %v1404_v24, %v501_v23  ;;  %vm508_vm6 = vweird.f32 %v1404_v24 }
 0xbfe   :  { %vm509_vm8 = vmor %vm507_vm7, %vm508_vm6 }
 0xbff   :  { %v504_v26 = vsub.f32 1.0, %v503_v25 }
 0xc01   :  { %v505_v27 = vmul.f32 %v1404_v24, %v504_v26 }
 0xc03   :  { %v506_v32 = vadd.f32 %v1404_v24, %v505_v27 }
 0xc05   :  { %v510_v0 = vsel %vm509_vm8, %v1404_v24, %v506_v32 }
 0xc06   :  { %v515_v36 = vsel %vm512_vm9, %v514_v35, %v510_v0 }
 0xc07   :  { %v518_v37 = vmul.f32 %v515_v36, %v441_v12 }
 0xc4c   :  { %v521_v1 = vpop.permute.xlu2 %520 }
 0xc4d   :  { %v523_v2 = vmul.f32 %v521_v1, %v515_v36 }
 0xc4f   :  { %525 = vrot.lane.b32.xlu0 %v523_v2, %s1492_s10 }
 0xcc1   :  { %v526_v38 = vpop.permute.xlu0 %525 }
 0xcc2   :  { %v1694_v39 = vadd.f32 %v526_v38, %v518_v37  ;;  %v1774_v38 = vpop.f32.mrf.mxu1 }
 0xcc4   :  { %1405 = vtanh.f32 %v1694_v39 }
 0xcca   :  { %v1406_v3 = vpop.eup %1405 }
 0xccb   :  { %531 = vrot.lane.b32.xlu1 %v1406_v3, %s1492_s10 }
 0xd3d   :  { %v532_v40 = vpop.permute.xlu1 %531 }
 0xd3e   :  { %v534_v41 = vmul.f32 %v532_v40, %v515_v36  ;;  %v209_v40 = vpop.f32.mrf.mxu3 }
 0xd40   :  { %536 = vrot.lane.b32.xlu2 %v534_v41, %s1493_s1  ;;  %v210_v41 = vadd.f32 %v1748_v50, %v209_v40 }
 0xd9a   :  { %v537_v46 = vpop.permute.xlu2 %536 }
 0xd9b   :  { %1328 = vmatmul.msk.f32.vlgmr.msra.gmra.mxu3 %vm39_vm4, %v537_v46  ;;  %1330 = vmatmul.msk.f32.vlgmr.msrb.gmra.mxu0 %vm39_vm4, %v537_v46 }
 0xd9c   :  { %945 = vmatpush.msra.mxu3 %v1702_v42  ;;  %1009 = vmatpush.msrb.mxu0 %v1702_v42 }
 0xd9e   :  { %946 = vmatpush.msra.mxu3 %v1707_v43  ;;  %1010 = vmatpush.msrb.mxu0 %v1707_v43 }
 0xda0   :  { %947 = vmatpush.msra.mxu3 %v1714_v44  ;;  %1011 = vmatpush.msrb.mxu0 %v1714_v44 }
 0xda2   :  { %948 = vmatpush.msra.mxu3 %v1722_v45  ;;  %1012 = vmatpush.msrb.mxu0 %v1722_v45 }
 0xda3   :  { %757 = vmatmul.f32.vlgmr.msra.gmra.mxu0 %v1491_v4 }
 0xe18   :  { %v581_v48 = vpop.f32.mrf.mxu0 }
 0xe19   :  { %v584_v49 = vadd.f32 %v1329_v47, %v581_v48 }
 0xe1b   :  { %1407 = vtanh.f32 %v584_v49  ;;  %v1331_v56 = vmul.f32 -1.442695, %v584_v49 }
 0xe20   :  { %v758_v53 = vpop.f32.mrf.mxu0 }
 0xe21   :  { %v1408_v54 = vpop.eup %1407  ;;  %v761_v55 = vadd.f32 %v758_v53, %v124_v52 }
 0xe22   :  { %607 = vrot.lane.b32.xlu0 %v1408_v54, %s1492_s10 }
 0xe23   :  { %1409 = vtanh.f32 %v761_v55  ;;  %v1337_v57 = vmul.f32 -1.442695, %v761_v55 }
 0xe24   :  { %1411 = vpow2.f32 %v1331_v56 }
 0xe25   :  { %1413 = vpow2.f32 %v1337_v57 }
 0xe29   :  { %v1410_v4 = vpop.eup %1409 }
 0xe2a   :  { %784 = vrot.lane.b32.xlu1 %v1410_v4, %s1492_s10  ;;  %v1412_v58 = vpop.eup %1411 }
 0xe2b   :  { %v588_v59 = vadd.f32 1.0, %v1412_v58  ;;  %v1414_v28 = vpop.eup %1413 }
 0xe2c   :  { %v765_v29 = vadd.f32 1.0, %v1414_v28 }
 0xe2d   :  { %1415 = vrcp.f32 %v588_v59  ;;  %v600_v7 = vand.u32 2147483648, %v588_v59  ;;  %vm594_vm11 = vweird.f32 %v588_v59  ;;  %v598_v8 = vand.u32 2147483647, %v588_v59 }
 0xe2e   :  { %1417 = vrcp.f32 %v765_v29  ;;  %v777_v16 = vand.u32 2147483648, %v765_v29  ;;  %vm771_vm15 = vweird.f32 %v765_v29  ;;  %v775_v17 = vand.u32 2147483647, %v765_v29 }
 0xe2f   :  { %v601_v11 = vor.u32 1.1754944e-38, %v600_v7  ;;  %vm599_vm13 = vcmp.eq.f32.partialorder %v598_v8, 8.507059e+37 }
 0xe30   :  { %v778_v19 = vor.u32 1.1754944e-38, %v777_v16  ;;  %vm776_vm1 = vcmp.eq.f32.partialorder %v775_v17, 8.507059e+37 }
 0xe33   :  { %v1416_v60 = vpop.eup %1415 }
 0xe34   :  { %v590_v30 = vmul.f32 %v1416_v60, %v588_v59  ;;  %v1418_v31 = vpop.eup %1417  ;;  %vm595_vm10 = vweird.f32 %v1416_v60  ;;  %v1333_v59 = vld [vmem:[%s1864_s0 + $0x38] sm:$0xff] }
 0xe35   :  { %v767_v63 = vmul.f32 %v1418_v31, %v765_v29  ;;  %vm596_vm12 = vmor %vm594_vm11, %vm595_vm10  ;;  %vm772_vm14 = vweird.f32 %v1418_v31 }
 0xe36   :  { %v591_v61 = vsub.f32 1.0, %v590_v30  ;;  %vm773_vm0 = vmor %vm771_vm15, %vm772_vm14 }
 0xe37   :  { %v768_v6 = vsub.f32 1.0, %v767_v63 }
 0xe38   :  { %v592_v62 = vmul.f32 %v1416_v60, %v591_v61 }
 0xe39   :  { %v769_v10 = vmul.f32 %v1418_v31, %v768_v6 }
 0xe3a   :  { %v593_v5 = vadd.f32 %v1416_v60, %v592_v62 }
 0xe3b   :  { %v770_v15 = vadd.f32 %v1418_v31, %v769_v10 }
 0xe3c   :  { %v597_v9 = vsel %vm596_vm12, %v1416_v60, %v593_v5 }
 0xe3d   :  { %v602_v13 = vsel %vm599_vm13, %v601_v11, %v597_v9  ;;  %v774_v18 = vsel %vm773_vm0, %v1418_v31, %v770_v15 }
 0xe3e   :  { %v779_v21 = vsel %vm776_vm1, %v778_v19, %v774_v18  ;;  %v605_v23 = vmul.f32 %v602_v13, %v1694_v39  ;;  %v1776_v39 = vpop.f32.mrf.mxu1 }
 0xe3f   :  { %v782_v27 = vmul.f32 0.0, %v779_v21 }
 0xe94   :  { %v608_v12 = vpop.permute.xlu0 %607 }
 0xe95   :  { %v610_v14 = vmul.f32 %v608_v12, %v602_v13 }
 0xe97   :  { %612 = vrot.lane.b32.xlu2 %v610_v14, %s1492_s10 }
 0xe9c   :  { %v785_v20 = vpop.permute.xlu1 %784 }
 0xe9d   :  { %v787_v22 = vmul.f32 %v785_v20, %v779_v21 }
 0xe9f   :  { %789 = vrot.lane.b32.xlu0 %v787_v22, %s1492_s10 }
 0xef1   :  { %v613_v24 = vpop.permute.xlu2 %612 }
 0xef2   :  { %v1756_v25 = vadd.f32 %v613_v24, %v605_v23 }
 0xef4   :  { %1419 = vtanh.f32 %v1756_v25 }
 0xefa   :  { %v1420_v26 = vpop.eup %1419 }
 0xefb   :  { %618 = vrot.lane.b32.xlu1 %v1420_v26, %s1492_s10 }
 0xf11   :  { %v790_v32 = vpop.permute.xlu0 %789 }
 0xf12   :  { %v792_v33 = vadd.f32 %v790_v32, %v782_v27  ;;  %v297_v32 = vadd.f32 %v1748_v50, %v1774_v38 }
 0xf14   :  { %1421 = vtanh.f32 %v792_v33 }
 0xf1a   :  { %v1422_v34 = vpop.eup %1421 }
 0xf1b   :  { %795 = vrot.lane.b32.xlu2 %v1422_v34, %s1492_s10 }
 0xf6d   :  { %v619_v0 = vpop.permute.xlu1 %618 }
 0xf6e   :  { %v621_v35 = vmul.f32 %v619_v0, %v602_v13 }
 0xf70   :  { %623 = vrot.lane.b32.xlu0 %v621_v35, %s1493_s1 }
 0xf75   :  { %v796_v1 = vpop.permute.xlu2 %795 }
 0xf76   :  { %v798_v36 = vmul.f32 %v796_v1, %v779_v21 }
 0xf78   :  { %801 = vrot.lane.b32.xlu1 %v798_v36, %s1493_s1 }
 0xfe2   :  { %v624_v2 = vpop.permute.xlu0 %623 }
 0xfe3   :  { %1332 = vmatmul.msk.f32.vlgmr.msrb.gmra.mxu1 %vm39_vm4, %v624_v2  ;;  %1334 = vmatmul.msk.f32.vlgmr.msrb.gmra.mxu2 %vm39_vm4, %v624_v2 }
 0xfe4   :  { %1073 = vmatpush.msrb.mxu1 %v1702_v42  ;;  %1137 = vmatpush.msrb.mxu2 %v1702_v42 }
 0xfe6   :  { %1074 = vmatpush.msrb.mxu1 %v1707_v43  ;;  %1138 = vmatpush.msrb.mxu2 %v1707_v43 }
 0xfe8   :  { %1075 = vmatpush.msrb.mxu1 %v1714_v44  ;;  %1139 = vmatpush.msrb.mxu2 %v1714_v44 }
 0xfea   :  { %v802_v37 = vpop.permute.xlu1 %801  ;;  %1076 = vmatpush.msrb.mxu1 %v1722_v45  ;;  %1140 = vmatpush.msrb.mxu2 %v1722_v45 }
 0xfeb   :  { %1338 = vmatmul.msk.f32.vlgmr.msra.gmra.mxu1 %vm39_vm4, %v802_v37 }
0x1060   :  { %v1778_v3 = vpop.f32.mrf.mxu1 }
0x1066   :  { %v668_v28 = vpop.f32.mrf.mxu2 }
0x1067   :  { %v671_v30 = vadd.f32 %v1333_v59, %v668_v28 }
0x1068   :  { %v822_v46 = vpop.f32.mrf.mxu1 }
0x1069   :  { %v825_v47 = vadd.f32 %v822_v46, %v210_v41  ;;  %v1335_v9 = vmul.f32 -1.442695, %v671_v30 }
0x106b   :  { %1423 = vtanh.f32 %v825_v47  ;;  %v1339_v49 = vmul.f32 -1.442695, %v825_v47 }
0x106d   :  { %1425 = vpow2.f32 %v1339_v49 }
0x1071   :  { %v1424_v48 = vpop.eup %1423 }
0x1072   :  { %848 = vrot.lane.b32.xlu2 %v1424_v48, %s1492_s10 }
0x1073   :  { %v1426_v51 = vpop.eup %1425 }
0x1074   :  { %v829_v52 = vadd.f32 1.0, %v1426_v51 }
0x1076   :  { %1427 = vrcp.f32 %v829_v52  ;;  %v841_v57 = vand.u32 2147483648, %v829_v52  ;;  %vm835_vm3 = vweird.f32 %v829_v52  ;;  %v839_v58 = vand.u32 2147483647, %v829_v52 }
0x1077   :  { %1429 = vtanh.f32 %v671_v30 }
0x1078   :  { %v842_v60 = vor.u32 1.1754944e-38, %v841_v57  ;;  %vm840_vm6 = vcmp.eq.f32.partialorder %v839_v58, 8.507059e+37 }
0x107c   :  { %v1428_v53 = vpop.eup %1427 }
0x107d   :  { %v831_v54 = vmul.f32 %v1428_v53, %v829_v52  ;;  %vm836_vm2 = vweird.f32 %v1428_v53  ;;  %v1430_v63 = vpop.eup %1429 }
0x107e   :  { %vm837_vm5 = vmor %vm835_vm3, %vm836_vm2 }
0x107f   :  { %v832_v55 = vsub.f32 1.0, %v831_v54 }
0x1081   :  { %v833_v4 = vmul.f32 %v1428_v53, %v832_v55 }
0x1083   :  { %v834_v56 = vadd.f32 %v1428_v53, %v833_v4 }
0x1085   :  { %v838_v29 = vsel %vm837_vm5, %v1428_v53, %v834_v56 }
0x1086   :  { %v843_v31 = vsel %vm840_vm6, %v842_v60, %v838_v29 }
0x1087   :  { %v846_v5 = vmul.f32 %v843_v31, %v792_v33 }
0x10cc   :  { %v849_v61 = vpop.permute.xlu2 %848 }
0x10cd   :  { %v851_v62 = vmul.f32 %v849_v61, %v843_v31 }
0x10cf   :  { %853 = vrot.lane.b32.xlu0 %v851_v62, %s1492_s10  ;;  %v383_v62 = vpop.f32.mrf.mxu3 }
0x10d7   :  { %694 = vrot.lane.b32.xlu0 %v1430_v63, %s1492_s10  ;;  %v1810_v63 = vpop.f32.mrf.mxu3 }
0x1141   :  { %v854_v6 = vpop.permute.xlu0 %853 }
0x1142   :  { %v1787_v7 = vadd.f32 %v854_v6, %v846_v5 }
0x1144   :  { %1431 = vtanh.f32 %v1787_v7 }
0x1145   :  { %1433 = vpow2.f32 %v1335_v9 }
0x1149   :  { %v695_v23 = vpop.permute.xlu0 %694 }
0x114a   :  { %v1432_v8 = vpop.eup %1431 }
0x114b   :  { %859 = vrot.lane.b32.xlu1 %v1432_v8, %s1492_s10  ;;  %v1434_v10 = vpop.eup %1433 }
0x114c   :  { %v675_v11 = vadd.f32 1.0, %v1434_v10 }
0x114e   :  { %1435 = vrcp.f32 %v675_v11  ;;  %v687_v19 = vand.u32 2147483648, %v675_v11  ;;  %vm681_vm8 = vweird.f32 %v675_v11  ;;  %v685_v20 = vand.u32 2147483647, %v675_v11 }
0x1150   :  { %v688_v22 = vor.u32 1.1754944e-38, %v687_v19  ;;  %vm686_vm10 = vcmp.eq.f32.partialorder %v685_v20, 8.507059e+37 }
0x1154   :  { %v1436_v12 = vpop.eup %1435 }
0x1155   :  { %v677_v13 = vmul.f32 %v1436_v12, %v675_v11  ;;  %vm682_vm7 = vweird.f32 %v1436_v12 }
0x1156   :  { %vm683_vm9 = vmor %vm681_vm8, %vm682_vm7 }
0x1157   :  { %v678_v14 = vsub.f32 1.0, %v677_v13 }
0x1159   :  { %v679_v15 = vmul.f32 %v1436_v12, %v678_v14 }
0x115b   :  { %v680_v17 = vadd.f32 %v1436_v12, %v679_v15 }
0x115d   :  { %v684_v21 = vsel %vm683_vm9, %v1436_v12, %v680_v17 }
0x115e   :  { %v689_v24 = vsel %vm686_vm10, %v688_v22, %v684_v21 }
0x115f   :  { %v697_v26 = vmul.f32 %v695_v23, %v689_v24  ;;  %v692_v35 = vmul.f32 %v689_v24, %v1756_v25 }
0x11bd   :  { %v860_v16 = vpop.permute.xlu1 %859 }
0x11be   :  { %v862_v18 = vmul.f32 %v860_v16, %v843_v31 }
0x11c0   :  { %865 = vrot.lane.b32.xlu2 %v862_v18, %s1493_s1 }
0x11c8   :  { %699 = vrot.lane.b32.xlu2 %v697_v26, %s1492_s10 }
0x121a   :  { %v866_v27 = vpop.permute.xlu2 %865 }
0x121b   :  { %1340 = vmatmul.msk.f32.vlgmr.msra.gmra.mxu2 %vm39_vm4, %v866_v27 }
0x1222   :  { %v700_v0 = vpop.permute.xlu2 %699 }
0x1223   :  { %v702_v1 = vadd.f32 %v700_v0, %v692_v35 }
0x129e   :  { %v886_v33 = vpop.f32.mrf.mxu2 }
0x129f   :  { %v889_v34 = vadd.f32 %v886_v33, %v297_v32  ;;  %v471_v33 = vadd.f32 %v1748_v50, %v1776_v39 }
0x12a1   :  { %1437 = vtanh.f32 %v889_v34  ;;  %v1341_v37 = vmul.f32 -1.442695, %v889_v34 }
0x12a2   :  { %1439 = vtanh.f32 %v702_v1 }
0x12a3   :  { %1441 = vpow2.f32 %v1341_v37 }
0x12a7   :  { %v1438_v36 = vpop.eup %1437 }
0x12a8   :  { %912 = vrot.lane.b32.xlu1 %v1438_v36, %s1492_s10  ;;  %v1440_v2 = vpop.eup %1439 }
0x12a9   :  { %v1442_v40 = vpop.eup %1441 }
0x12aa   :  { %v893_v41 = vadd.f32 1.0, %v1442_v40 }
0x12ac   :  { %1443 = vrcp.f32 %v893_v41  ;;  %v905_v25 = vand.u32 2147483648, %v893_v41  ;;  %vm899_vm12 = vweird.f32 %v893_v41  ;;  %v903_v51 = vand.u32 2147483647, %v893_v41 }
0x12ae   :  { %v906_v53 = vor.u32 1.1754944e-38, %v905_v25  ;;  %vm904_vm14 = vcmp.eq.f32.partialorder %v903_v51, 8.507059e+37 }
0x12b0   :  { %705 = vrot.lane.b32.xlu1 %v1440_v2, %s1492_s10 }
0x12b2   :  { %v1444_v38 = vpop.eup %1443 }
0x12b3   :  { %v895_v46 = vmul.f32 %v1444_v38, %v893_v41  ;;  %vm900_vm11 = vweird.f32 %v1444_v38 }
0x12b4   :  { %vm901_vm13 = vmor %vm899_vm12, %vm900_vm11 }
0x12b5   :  { %v896_v47 = vsub.f32 1.0, %v895_v46 }
0x12b7   :  { %v897_v48 = vmul.f32 %v1444_v38, %v896_v47 }
0x12b9   :  { %v898_v49 = vadd.f32 %v1444_v38, %v897_v48 }
0x12bb   :  { %v902_v52 = vsel %vm901_vm13, %v1444_v38, %v898_v49 }
0x12bc   :  { %v907_v55 = vsel %vm904_vm14, %v906_v53, %v902_v52 }
0x12bd   :  { %v910_v58 = vmul.f32 %v907_v55, %v1787_v7 }
0x131a   :  { %v913_v54 = vpop.permute.xlu1 %912 }
0x131b   :  { %v915_v4 = vmul.f32 %v913_v54, %v907_v55 }
0x131d   :  { %917 = vrot.lane.b32.xlu0 %v915_v4, %s1492_s10 }
0x1322   :  { %v706_v56 = vpop.permute.xlu1 %705 }
0x1323   :  { %v708_v57 = vmul.f32 %v706_v56, %v689_v24 }
0x1325   :  { %710 = vrot.lane.b32.xlu0 %v708_v57, %s1493_s1 }
0x138f   :  { %v918_v59 = vpop.permute.xlu0 %917 }
0x1390   :  { %v920_v28 = vadd.f32 %v918_v59, %v910_v58  ;;  %v558_v59 = vadd.f32 %v1748_v50, %v1810_v63 }
0x1392   :  { %1445 = vtanh.f32 %v920_v28 }
0x1397   :  { %v711_v29 = vpop.permute.xlu0 %710 }
0x1398   :  { %v1446_v60 = vpop.eup %1445  ;;  %1336 = vmatmul.msk.f32.vlgmr.msrb.gmra.mxu3 %vm39_vm4, %v711_v29 }
0x1399   :  { %923 = vrot.lane.b32.xlu2 %v1446_v60, %s1492_s10  ;;  %1201 = vmatpush.msrb.mxu3 %v1702_v42  ;;  %v384_v42 = vadd.f32 %v1748_v50, %v383_v62 }
0x139b   :  { %1202 = vmatpush.msrb.mxu3 %v1707_v43 }
0x139d   :  { %1203 = vmatpush.msrb.mxu3 %v1714_v44 }
0x139f   :  { %1204 = vmatpush.msrb.mxu3 %v1722_v45 }
0x13f3   :  { %v924_v30 = vpop.permute.xlu2 %923 }
0x13f4   :  { %v926_v61 = vmul.f32 %v924_v30, %v907_v55 }
0x13f6   :  { %929 = vrot.lane.b32.xlu1 %v926_v61, %s1493_s1 }
0x141b   :  { %v1812_v5 = vpop.f32.mrf.mxu3 }
0x1468   :  { %v930_v31 = vpop.permute.xlu1 %929 }
0x1469   :  { %1342 = vmatmul.msk.f32.vlgmr.msra.gmra.mxu3 %vm39_vm4, %v930_v31 }
0x14ec   :  { %v950_v6 = vpop.f32.mrf.mxu3 }
0x14ed   :  { %v953_v43 = vadd.f32 %v950_v6, %v384_v42 }
0x14ef   :  { %1447 = vtanh.f32 %v953_v43  ;;  %v1343_v45 = vmul.f32 -1.442695, %v953_v43 }
0x14f1   :  { %1449 = vpow2.f32 %v1343_v45 }
0x14f5   :  { %v1448_v44 = vpop.eup %1447 }
0x14f6   :  { %976 = vrot.lane.b32.xlu2 %v1448_v44, %s1492_s10 }
0x14f7   :  { %v1450_v7 = vpop.eup %1449 }
0x14f8   :  { %v957_v8 = vadd.f32 1.0, %v1450_v7 }
0x14fa   :  { %1451 = vrcp.f32 %v957_v8  ;;  %v969_v14 = vand.u32 2147483648, %v957_v8  ;;  %vm963_vm0 = vweird.f32 %v957_v8  ;;  %v967_v15 = vand.u32 2147483647, %v957_v8 }
0x14fc   :  { %v970_v17 = vor.u32 1.1754944e-38, %v969_v14  ;;  %vm968_vm2 = vcmp.eq.f32.partialorder %v967_v15, 8.507059e+37 }
0x1500   :  { %v1452_v9 = vpop.eup %1451 }
0x1501   :  { %v959_v10 = vmul.f32 %v1452_v9, %v957_v8  ;;  %vm964_vm15 = vweird.f32 %v1452_v9 }
0x1502   :  { %vm965_vm1 = vmor %vm963_vm0, %vm964_vm15 }
0x1503   :  { %v960_v11 = vsub.f32 1.0, %v959_v10 }
0x1505   :  { %v961_v12 = vmul.f32 %v1452_v9, %v960_v11 }
0x1507   :  { %v962_v13 = vadd.f32 %v1452_v9, %v961_v12 }
0x1509   :  { %v966_v16 = vsel %vm965_vm1, %v1452_v9, %v962_v13 }
0x150a   :  { %v971_v19 = vsel %vm968_vm2, %v970_v17, %v966_v16 }
0x150b   :  { %v974_v21 = vmul.f32 %v971_v19, %v920_v28 }
0x1550   :  { %v977_v18 = vpop.permute.xlu2 %976 }
0x1551   :  { %v979_v20 = vmul.f32 %v977_v18, %v971_v19 }
0x1553   :  { %981 = vrot.lane.b32.xlu0 %v979_v20, %s1492_s10 }
0x15c5   :  { %v982_v22 = vpop.permute.xlu0 %981 }
0x15c6   :  { %v984_v23 = vadd.f32 %v982_v22, %v974_v21 }
0x15c8   :  { %1453 = vtanh.f32 %v984_v23 }
0x15ce   :  { %v1454_v24 = vpop.eup %1453 }
0x15cf   :  { %987 = vrot.lane.b32.xlu1 %v1454_v24, %s1492_s10 }
0x1641   :  { %v988_v26 = vpop.permute.xlu1 %987 }
0x1642   :  { %v990_v27 = vmul.f32 %v988_v26, %v971_v19  ;;  %v645_v19 = vadd.f32 %v1748_v50, %v1778_v3 }
0x1644   :  { %993 = vrot.lane.b32.xlu2 %v990_v27, %s1493_s1 }
0x169e   :  { %v994_v32 = vpop.permute.xlu2 %993 }
0x169f   :  { %1344 = vmatmul.msk.f32.vlgmr.msrb.gmra.mxu0 %vm39_vm4, %v994_v32 }
0x171c   :  { %v1014_v34 = vpop.f32.mrf.mxu0 }
0x171d   :  { %v1017_v0 = vadd.f32 %v1014_v34, %v471_v33 }
0x171f   :  { %1455 = vtanh.f32 %v1017_v0  ;;  %v1345_v1 = vmul.f32 -1.442695, %v1017_v0 }
0x1721   :  { %1457 = vpow2.f32 %v1345_v1 }
0x1725   :  { %v1456_v35 = vpop.eup %1455 }
0x1726   :  { %1040 = vrot.lane.b32.xlu0 %v1456_v35, %s1492_s10 }
0x1727   :  { %v1458_v36 = vpop.eup %1457 }
0x1728   :  { %v1021_v2 = vadd.f32 1.0, %v1458_v36 }
0x172a   :  { %1459 = vrcp.f32 %v1021_v2  ;;  %v1033_v47 = vand.u32 2147483648, %v1021_v2  ;;  %vm1027_vm5 = vweird.f32 %v1021_v2  ;;  %v1031_v39 = vand.u32 2147483647, %v1021_v2 }
0x172c   :  { %v1034_v49 = vor.u32 1.1754944e-38, %v1033_v47  ;;  %vm1032_vm7 = vcmp.eq.f32.partialorder %v1031_v39, 8.507059e+37 }
0x1730   :  { %v1460_v37 = vpop.eup %1459 }
0x1731   :  { %v1023_v40 = vmul.f32 %v1460_v37, %v1021_v2  ;;  %vm1028_vm3 = vweird.f32 %v1460_v37 }
0x1732   :  { %vm1029_vm6 = vmor %vm1027_vm5, %vm1028_vm3 }
0x1733   :  { %v1024_v41 = vsub.f32 1.0, %v1023_v40 }
0x1735   :  { %v1025_v38 = vmul.f32 %v1460_v37, %v1024_v41 }
0x1737   :  { %v1026_v46 = vadd.f32 %v1460_v37, %v1025_v38 }
0x1739   :  { %v1030_v48 = vsel %vm1029_vm6, %v1460_v37, %v1026_v46 }
0x173a   :  { %v1035_v51 = vsel %vm1032_vm7, %v1034_v49, %v1030_v48 }
0x173b   :  { %v1038_v53 = vmul.f32 %v1035_v51, %v984_v23 }
0x1798   :  { %v1041_v25 = vpop.permute.xlu0 %1040 }
0x1799   :  { %v1043_v52 = vmul.f32 %v1041_v25, %v1035_v51  ;;  %v732_v25 = vadd.f32 %v1748_v50, %v1812_v5 }
0x179b   :  { %1045 = vrot.lane.b32.xlu1 %v1043_v52, %s1492_s10 }
0x180d   :  { %v1046_v54 = vpop.permute.xlu1 %1045 }
0x180e   :  { %v1048_v55 = vadd.f32 %v1046_v54, %v1038_v53 }
0x1810   :  { %1461 = vtanh.f32 %v1048_v55 }
0x1816   :  { %v1462_v4 = vpop.eup %1461 }
0x1817   :  { %1051 = vrot.lane.b32.xlu2 %v1462_v4, %s1492_s10 }
0x1871   :  { %v1052_v56 = vpop.permute.xlu2 %1051 }
0x1872   :  { %v1054_v57 = vmul.f32 %v1052_v56, %v1035_v51 }
0x1874   :  { %1057 = vrot.lane.b32.xlu0 %v1054_v57, %s1493_s1 }
0x18e6   :  { %v1058_v58 = vpop.permute.xlu0 %1057 }
0x18e7   :  { %1346 = vmatmul.msk.f32.vlgmr.msrb.gmra.mxu1 %vm39_vm4, %v1058_v58 }
0x1964   :  { %v1078_v28 = vpop.f32.mrf.mxu1 }
0x1965   :  { %v1081_v29 = vadd.f32 %v1078_v28, %v558_v59 }
0x1967   :  { %1463 = vtanh.f32 %v1081_v29  ;;  %v1347_v30 = vmul.f32 -1.442695, %v1081_v29 }
0x1969   :  { %1465 = vpow2.f32 %v1347_v30 }
0x196d   :  { %v1464_v60 = vpop.eup %1463 }
0x196e   :  { %1104 = vrot.lane.b32.xlu1 %v1464_v60, %s1492_s10 }
0x196f   :  { %v1466_v61 = vpop.eup %1465 }
0x1970   :  { %v1085_v31 = vadd.f32 1.0, %v1466_v61 }
0x1972   :  { %1467 = vrcp.f32 %v1085_v31  ;;  %v1097_v45 = vand.u32 2147483648, %v1085_v31  ;;  %vm1091_vm9 = vweird.f32 %v1085_v31  ;;  %v1095_v63 = vand.u32 2147483647, %v1085_v31 }
0x1974   :  { %v1098_v8 = vor.u32 1.1754944e-38, %v1097_v45  ;;  %vm1096_vm11 = vcmp.eq.f32.partialorder %v1095_v63, 8.507059e+37 }
0x1978   :  { %v1468_v62 = vpop.eup %1467 }
0x1979   :  { %v1087_v42 = vmul.f32 %v1468_v62, %v1085_v31  ;;  %vm1092_vm8 = vweird.f32 %v1468_v62 }
0x197a   :  { %vm1093_vm10 = vmor %vm1091_vm9, %vm1092_vm8 }
0x197b   :  { %v1088_v6 = vsub.f32 1.0, %v1087_v42 }
0x197d   :  { %v1089_v43 = vmul.f32 %v1468_v62, %v1088_v6 }
0x197f   :  { %v1090_v44 = vadd.f32 %v1468_v62, %v1089_v43 }
0x1981   :  { %v1094_v7 = vsel %vm1093_vm10, %v1468_v62, %v1090_v44 }
0x1982   :  { %v1099_v10 = vsel %vm1096_vm11, %v1098_v8, %v1094_v7  ;;  %v1494_v8 = vmov 32.0  }
0x1983   :  { %v1102_v12 = vmul.f32 %v1099_v10, %v1048_v55 }
0x19e0   :  { %v1105_v9 = vpop.permute.xlu1 %1104 }
0x19e1   :  { %v1107_v11 = vmul.f32 %v1105_v9, %v1099_v10 }
0x19e3   :  { %1109 = vrot.lane.b32.xlu2 %v1107_v11, %s1492_s10 }
0x1a3d   :  { %v1110_v13 = vpop.permute.xlu2 %1109 }
0x1a3e   :  { %v1112_v14 = vadd.f32 %v1110_v13, %v1102_v12 }
0x1a40   :  { %1469 = vtanh.f32 %v1112_v14 }
0x1a46   :  { %v1470_v15 = vpop.eup %1469 }
0x1a47   :  { %1115 = vrot.lane.b32.xlu0 %v1470_v15, %s1492_s10 }
0x1ab9   :  { %v1116_v16 = vpop.permute.xlu0 %1115 }
0x1aba   :  { %v1118_v17 = vmul.f32 %v1116_v16, %v1099_v10 }
0x1abc   :  { %1121 = vrot.lane.b32.xlu1 %v1118_v17, %s1493_s1 }
0x1b2e   :  { %v1122_v18 = vpop.permute.xlu1 %1121 }
0x1b2f   :  { %1348 = vmatmul.msk.f32.vlgmr.msrb.gmra.mxu2 %vm39_vm4, %v1122_v18 }
0x1bb2   :  { %v1142_v20 = vpop.f32.mrf.mxu2 }
0x1bb3   :  { %v1145_v21 = vadd.f32 %v1142_v20, %v645_v19  ;;  %v1357_v19 = vld [vmem:[%s1868_s5] ss:$0 sm:$0xff] }
0x1bb4   :  { %v1358_v20 = vld [vmem:[%s1869_s6] ss:$0 sm:$0xff] }
0x1bb5   :  { %1471 = vtanh.f32 %v1145_v21  ;;  %v1349_v23 = vmul.f32 -1.442695, %v1145_v21 }
0x1bb7   :  { %1473 = vpow2.f32 %v1349_v23 }
0x1bbb   :  { %v1472_v22 = vpop.eup %1471 }
0x1bbc   :  { %1168 = vrot.lane.b32.xlu2 %v1472_v22, %s1492_s10 }
0x1bbd   :  { %v1474_v24 = vpop.eup %1473 }
0x1bbe   :  { %v1149_v26 = vadd.f32 1.0, %v1474_v24 }
0x1bc0   :  { %1475 = vrcp.f32 %v1149_v26  ;;  %v1161_v35 = vand.u32 2147483648, %v1149_v26  ;;  %vm1155_vm13 = vweird.f32 %v1149_v26  ;;  %v1159_v3 = vand.u32 2147483647, %v1149_v26 }
0x1bc2   :  { %v1162_v36 = vor.u32 1.1754944e-38, %v1161_v35  ;;  %vm1160_vm15 = vcmp.eq.f32.partialorder %v1159_v3, 8.507059e+37 }
0x1bc6   :  { %v1476_v27 = vpop.eup %1475 }
0x1bc7   :  { %v1151_v32 = vmul.f32 %v1476_v27, %v1149_v26  ;;  %vm1156_vm12 = vweird.f32 %v1476_v27 }
0x1bc8   :  { %vm1157_vm14 = vmor %vm1155_vm13, %vm1156_vm12 }
0x1bc9   :  { %v1152_v33 = vsub.f32 1.0, %v1151_v32 }
0x1bcb   :  { %v1153_v34 = vmul.f32 %v1476_v27, %v1152_v33 }
0x1bcd   :  { %v1154_v0 = vadd.f32 %v1476_v27, %v1153_v34 }
0x1bcf   :  { %v1158_v1 = vsel %vm1157_vm14, %v1476_v27, %v1154_v0 }
0x1bd0   :  { %v1163_v37 = vsel %vm1160_vm15, %v1162_v36, %v1158_v1 }
0x1bd1   :  { %v1166_v41 = vmul.f32 %v1163_v37, %v1112_v14 }
0x1c16   :  { %v1169_v2 = vpop.permute.xlu2 %1168 }
0x1c17   :  { %v1171_v40 = vmul.f32 %v1169_v2, %v1163_v37 }
0x1c19   :  { %1173 = vrot.lane.b32.xlu0 %v1171_v40, %s1492_s10 }
0x1c8b   :  { %v1174_v38 = vpop.permute.xlu0 %1173 }
0x1c8c   :  { %v1176_v46 = vadd.f32 %v1174_v38, %v1166_v41 }
0x1c8e   :  { %1477 = vtanh.f32 %v1176_v46 }
0x1c94   :  { %v1478_v47 = vpop.eup %1477 }
0x1c95   :  { %1179 = vrot.lane.b32.xlu1 %v1478_v47, %s1492_s10 }
0x1d07   :  { %v1180_v39 = vpop.permute.xlu1 %1179 }
0x1d08   :  { %v1182_v48 = vmul.f32 %v1180_v39, %v1163_v37 }
0x1d0a   :  { %1185 = vrot.lane.b32.xlu2 %v1182_v48, %s1493_s1 }
0x1d64   :  { %v1186_v49 = vpop.permute.xlu2 %1185 }
0x1d65   :  { %1350 = vmatmul.msk.f32.vlgmr.msrb.gmra.mxu3 %vm39_vm4, %v1186_v49 }
0x1de8   :  { %v1206_v51 = vpop.f32.mrf.mxu3 }
0x1de9   :  { %v1209_v52 = vadd.f32 %v1206_v51, %v732_v25 }
0x1deb   :  { %1479 = vtanh.f32 %v1209_v52  ;;  %v1351_v54 = vmul.f32 -1.442695, %v1209_v52 }
0x1ded   :  { %1481 = vpow2.f32 %v1351_v54 }
0x1df1   :  { %v1480_v53 = vpop.eup %1479 }
0x1df2   :  { %1232 = vrot.lane.b32.xlu0 %v1480_v53, %s1492_s10 }
0x1df3   :  { %v1482_v55 = vpop.eup %1481 }
0x1df4   :  { %v1213_v4 = vadd.f32 1.0, %v1482_v55 }
0x1df6   :  { %1483 = vrcp.f32 %v1213_v4  ;;  %v1225_v29 = vand.u32 2147483648, %v1213_v4  ;;  %vm1219_vm1 = vweird.f32 %v1213_v4  ;;  %v1223_v50 = vand.u32 2147483647, %v1213_v4 }
0x1df8   :  { %v1226_v60 = vor.u32 1.1754944e-38, %v1225_v29  ;;  %vm1224_vm3 = vcmp.eq.f32.partialorder %v1223_v50, 8.507059e+37 }
0x1dfc   :  { %v1484_v56 = vpop.eup %1483 }
0x1dfd   :  { %v1215_v57 = vmul.f32 %v1484_v56, %v1213_v4  ;;  %vm1220_vm0 = vweird.f32 %v1484_v56 }
0x1dfe   :  { %vm1221_vm2 = vmor %vm1219_vm1, %vm1220_vm0 }
0x1dff   :  { %v1216_v58 = vsub.f32 1.0, %v1215_v57 }
0x1e01   :  { %v1217_v59 = vmul.f32 %v1484_v56, %v1216_v58 }
0x1e03   :  { %v1218_v28 = vadd.f32 %v1484_v56, %v1217_v59 }
0x1e05   :  { %v1222_v5 = vsel %vm1221_vm2, %v1484_v56, %v1218_v28 }
0x1e06   :  { %v1227_v61 = vsel %vm1224_vm3, %v1226_v60, %v1222_v5 }
0x1e07   :  { %v1230_v62 = vmul.f32 %v1227_v61, %v1176_v46 }
0x1e64   :  { %v1233_v30 = vpop.permute.xlu0 %1232 }
0x1e65   :  { %v1235_v31 = vmul.f32 %v1233_v30, %v1227_v61 }
0x1e67   :  { %1237 = vrot.lane.b32.xlu1 %v1235_v31, %s1492_s10 }
0x1ed9   :  { %v1238_v42 = vpop.permute.xlu1 %1237 }
0x1eda   :  { %v1240_v6 = vadd.f32 %v1238_v42, %v1230_v62 }
0x1edc   :  { %1485 = vtanh.f32 %v1240_v6 }
0x1edd   :  { %1487 = vrcp.f32 %v1494_v8 }
0x1ee2   :  { %v1486_v43 = vpop.eup %1485 }
0x1ee3   :  { %1243 = vrot.lane.b32.xlu2 %v1486_v43, %s1492_s10  ;;  %v1488_v9 = vpop.eup %1487 }
0x1ee4   :  { %v1255_v10 = vmul.f32 32.0, %v1488_v9  ;;  %vm1259_vm5 = vweird.f32 %v1488_v9 }
0x1ee6   :  { %v1256_v11 = vsub.f32 1.0, %v1255_v10 }
0x1ee8   :  { %v1257_v12 = vmul.f32 %v1488_v9, %v1256_v11 }
0x1eea   :  { %v1258_v13 = vadd.f32 %v1488_v9, %v1257_v12 }
0x1eec   :  { %v1260_v14 = vsel %vm1259_vm5, %v1488_v9, %v1258_v13 }
0x1f3d   :  { %v1244_v44 = vpop.permute.xlu2 %1243 }
0x1f3e   :  { %v1246_v45 = vmul.f32 %v1244_v44, %v1227_v61 }
0x1f40   :  { %1248 = vrot.lane.b32.xlu0 %v1246_v45, %s1493_s1 }
0x1fb2   :  { %v1249_v63 = vpop.permute.xlu0 %1248 }
0x1fb3   :  { %v1251_v7 = vsel %vm39_vm4, %v1249_v63, 0.0 }
0x1fb4   :  { %1252 = vadd.xlane.f32.xlu1 %v1251_v7 }
0x2027   :  { %v1253_v15 = vpop.xlane.xlu1 %1252 }
0x2028   :  { %v1261_v16 = vmul.f32 %v1260_v14, %v1253_v15 }
0x202a   :  { %v1262_v17 = vsub.f32 %v1246_v45, %v1261_v16 }
0x202c   :  { %v1263_v18 = vmul.f32 %v1262_v17, %v1262_v17 }
0x202e   :  { %1265 = vrot.lane.b32.xlu2 %v1263_v18, %s1493_s1 }
0x2036   :  { %1287 = vrot.lane.b32.xlu2 %v1357_v19, %s1493_s1 }
0x203e   :  { %1294 = vrot.lane.b32.xlu2 %v1358_v20, %s1493_s1 }
0x2088   :  { %v1266_v21 = vpop.permute.xlu2 %1265 }
0x2089   :  { %v1268_v22 = vsel %vm39_vm4, %v1266_v21, 0.0 }
0x208a   :  { %1269 = vadd.xlane.f32.xlu0 %v1268_v22 }
0x2090   :  { %v1288_v34 = vpop.permute.xlu2 %1287 }
0x2098   :  { %v1295_v2 = vpop.permute.xlu2 %1294 }
0x20fd   :  { %v1270_v23 = vpop.xlane.xlu0 %1269 }
0x20fe   :  { %v1271_v24 = vmul.f32 %v1270_v23, %v1260_v14 }
0x2100   :  { %v1272_v26 = vadd.f32 1e-05, %v1271_v24 }
0x2102   :  { %1489 = vrsqrt.f32 %v1272_v26  ;;  %vm1279_vm7 = vweird.f32 %v1272_v26 }
0x2108   :  { %v1490_v27 = vpop.eup %1489 }
0x2109   :  { %v1274_v32 = vmul.f32 %v1490_v27, %v1272_v26  ;;  %vm1280_vm6 = vweird.f32 %v1490_v27 }
0x210a   :  { %vm1281_vm8 = vmor %vm1279_vm7, %vm1280_vm6 }
0x210b   :  { %v1275_v33 = vmul.f32 %v1490_v27, %v1274_v32 }
0x210d   :  { %v1276_v0 = vmul.f32 0.5, %v1275_v33 }
0x210f   :  { %v1277_v35 = vsub.f32 1.5, %v1276_v0 }
0x2111   :  { %v1278_v3 = vmul.f32 %v1490_v27, %v1277_v35 }
0x2113   :  { %v1282_v1 = vsel %vm1281_vm8, %v1490_v27, %v1278_v3 }
0x2114   :  { %v1283_v36 = vmul.f32 %v1282_v1, %v1262_v17 }
0x2116   :  { %v1290_v37 = vmul.f32 %v1288_v34, %v1283_v36 }
0x2118   :  { %v1297_v40 = vadd.f32 %v1295_v2, %v1290_v37 }
0x211a   :  { %1299 = vrot.lane.b32.xlu2 %v1297_v40, %s1493_s1 }
0x2174   :  { %v1300_v41 = vpop.permute.xlu2 %1299 }
0x2175   :  { %1302 = vst.msk [vmem:[%s1870_s7] sm:$0xff] %vm39_vm4, %v1300_v41 }

</bundles_post_ra>
